<compile_context>
chip_gen: v5e
topology: v5e:2x2
jax: 0.10.0
libtpu: 0.0.40
codegen_flags: <defaults>
</compile_context>

<pallas_src>
import math

import jax
import jax.numpy as jnp
from jax.experimental import pallas as pl
from jax.experimental.pallas import tpu as pltpu

# Make the pure-JAX reference use true f32 matmuls so the comparison is fair.
jax.config.update("jax_default_matmul_precision", "highest")

D_MODEL = 32
NHEAD = 4
HEAD_DIM = D_MODEL // NHEAD
L_TGT = 8     # target (query) sequence length
S_MEM = 16    # memory (key/value) sequence length
BATCH = 2
LN_EPS = 1e-5


def _make_kernel(N, L, S, E, H):
    Dh = E // H
    LN = N * L
    SN = N * S

    def kernel(acts_ref, w_ref, vec_ref, out_ref):
        # acts: (2*LN + 2*SN, E) = [tgt | q_in | k_in | v_in], batch-major rows.
        acts = acts_ref[...]
        w = w_ref[...]           # (E, 4E) = [Wq^T*scale | Wk^T | Wv^T | Wo^T]
        vecs = vec_ref[...]      # (6, E)  = [bq*scale, bk, bv, bo, gamma, beta]

        tgt = acts[0:LN, :]      # residual rows (n, l)
        x = acts[LN:, :]         # (LN + 2*SN, E) fused projection input

        # Fused Q/K/V projection: one (80,32)@(32,96) matmul.
        y = jnp.dot(x, w[:, 0:3 * E], preferred_element_type=jnp.float32)
        q = y[0:LN, 0:E] + vecs[0:1, :]
        k = y[LN:LN + SN, E:2 * E] + vecs[1:2, :]
        v = y[LN + SN:LN + 2 * SN, 2 * E:3 * E] + vecs[2:3, :]

        q3 = q.reshape(N, L, E)
        k3 = k.reshape(N, S, E)
        v3 = v.reshape(N, S, E)
        wo_t = w[:, 3 * E:4 * E]                       # (E, E) = Wo^T

        # Per-head attention batched over N (static unrolled loop, H small).
        # Head recombination is fused into the output projection.
        acc = jnp.zeros((LN, E), jnp.float32)
        for h in range(H):
            sl = slice(h * Dh, (h + 1) * Dh)
            qh = q3[:, :, sl]                          # (N, L, Dh)
            kh = k3[:, :, sl]                          # (N, S, Dh)
            vh = v3[:, :, sl]                          # (N, S, Dh)
            s = jnp.einsum('nld,nsd->nls', qh, kh,
                           preferred_element_type=jnp.float32)   # (N, L, S)
            s = s - jnp.max(s, axis=-1, keepdims=True)
            p = jnp.exp(s)
            p = p / jnp.sum(p, axis=-1, keepdims=True)           # exact normalize
            oh = jnp.einsum('nls,nsd->nld', p, vh,
                            preferred_element_type=jnp.float32)  # (N, L, Dh)
            acc = acc + jnp.dot(oh.reshape(LN, Dh), wo_t[sl, :],
                                preferred_element_type=jnp.float32)

        tgt2 = acc + vecs[3:4, :]

        # Residual + LayerNorm over last dim (biased variance, matches torch).
        yln = tgt + tgt2
        mean = jnp.mean(yln, axis=-1, keepdims=True)
        var = jnp.mean((yln - mean) ** 2, axis=-1, keepdims=True)
        yln = (yln - mean) * jax.lax.rsqrt(var + LN_EPS)
        out_ref[...] = (yln * vecs[4:5, :] + vecs[5:6, :]).astype(out_ref.dtype)

    return kernel


def pack_params(params):
    """Model-init-time packing. Call ONCE, not per forward."""
    wq, wk, wv, bq, bk, bv, wo, bo, gamma, beta = params
    scale = 1.0 / math.sqrt(HEAD_DIM)
    # 1/sqrt(Dh) scale folded into the q projection (weights pre-transposed).
    w_all = jnp.concatenate([wq.T * scale, wk.T, wv.T, wo.T],
                            axis=1).astype(jnp.float32)            # (E, 4E) = (32, 128)
    vecs = jnp.stack([bq * scale, bk, bv, bo, gamma, beta]).astype(jnp.float32)  # (6, E)
    return w_all, vecs


@jax.jit
def _cross_attention_jit(tgt, memory, pos, query_pos, w_all, vecs):
    L, N, E = tgt.shape
    S = memory.shape[0]

    # Pack all activations into one batch-major (2*N*L + 2*N*S, E) slab; under
    # jit the transposes / pos adds / concat fuse into one producer fusion.
    def bm(x):  # (seq, N, E) -> (N*seq, E), batch-major rows
        return jnp.transpose(x, (1, 0, 2)).reshape(-1, E)

    acts = jnp.concatenate(
        [bm(tgt), bm(tgt + query_pos), bm(memory + pos), bm(memory)],
        axis=0).astype(jnp.float32)                               # (96, 32)

    out = pl.pallas_call(
        _make_kernel(N, L, S, E, NHEAD),
        out_shape=jax.ShapeDtypeStruct((N * L, E), tgt.dtype),
        in_specs=[pl.BlockSpec(memory_space=pltpu.MemorySpace.VMEM)
                  for _ in range(3)],
        out_specs=pl.BlockSpec(memory_space=pltpu.MemorySpace.VMEM),
    )(acts, w_all, vecs)

    return jnp.transpose(out.reshape(N, L, E), (1, 0, 2))          # (L, N, E)


def cross_attention_layer(tgt, memory, packed_params, pos=None, query_pos=None):
    """tgt: (L, N, E) f32, memory: (S, N, E) f32 (PyTorch seq-first layout)."""
    if query_pos is None:
        query_pos = jnp.zeros_like(tgt)
    if pos is None:
        pos = jnp.zeros_like(memory)
    w_all, vecs = packed_params
    return _cross_attention_jit(tgt, memory, pos, query_pos, w_all, vecs)


def make_params(key, d_model):
    """Deterministic synthetic params matching nn.MultiheadAttention + LayerNorm shapes."""
    ks = jax.random.split(key, 4)

    def xavier_uniform(k, shape):
        fan_in, fan_out = shape[1], shape[0]
        bound = math.sqrt(6.0 / (fan_in + fan_out))
        return jax.random.uniform(k, shape, jnp.float32, -bound, bound)

    wq = xavier_uniform(ks[0], (d_model, d_model))
    wk = xavier_uniform(ks[1], (d_model, d_model))
    wv = xavier_uniform(ks[2], (d_model, d_model))
    wo = xavier_uniform(ks[3], (d_model, d_model))
    bq = jnp.zeros((d_model,), jnp.float32)
    bk = jnp.zeros((d_model,), jnp.float32)
    bv = jnp.zeros((d_model,), jnp.float32)
    bo = jnp.zeros((d_model,), jnp.float32)
    gamma = jnp.ones((d_model,), jnp.float32)     # LayerNorm weight
    beta = jnp.zeros((d_model,), jnp.float32)     # LayerNorm bias
    return (wq, wk, wv, bq, bk, bv, wo, bo, gamma, beta)


def reference(tgt, memory, params, pos, query_pos):
    """Pure-JAX reference of forward_post (dropout=0)."""
    wq, wk, wv, bq, bk, bv, wo, bo, gamma, beta = params
    L, N, E = tgt.shape
    S = memory.shape[0]
    q_in = tgt + query_pos
    k_in = memory + pos
    q = jnp.einsum('lne,fe->lnf', q_in, wq) + bq
    k = jnp.einsum('sne,fe->snf', k_in, wk) + bk
    v = jnp.einsum('sne,fe->snf', memory, wv) + bv
    qh = q.reshape(L, N, NHEAD, HEAD_DIM)
    kh = k.reshape(S, N, NHEAD, HEAD_DIM)
    vh = v.reshape(S, N, NHEAD, HEAD_DIM)
    scores = jnp.einsum('lnhd,snhd->nhls', qh, kh) / math.sqrt(HEAD_DIM)
    p = jax.nn.softmax(scores, axis=-1)
    o = jnp.einsum('nhls,snhd->lnhd', p, vh).reshape(L, N, E)
    tgt2 = jnp.einsum('lne,fe->lnf', o, wo) + bo
    y = tgt + tgt2
    mean = jnp.mean(y, axis=-1, keepdims=True)
    var = jnp.mean((y - mean) ** 2, axis=-1, keepdims=True)
    return (y - mean) / jnp.sqrt(var + LN_EPS) * gamma + beta


if __name__ == "__main__":
    key = jax.random.PRNGKey(0)
    k_tgt, k_mem, k_qpos, k_pos, k_par = jax.random.split(key, 5)

    tgt = jax.random.normal(k_tgt, (L_TGT, BATCH, D_MODEL), jnp.float32)
    memory = jax.random.normal(k_mem, (S_MEM, BATCH, D_MODEL), jnp.float32)
    query_pos = jax.random.normal(k_qpos, (L_TGT, BATCH, D_MODEL), jnp.float32)
    pos = jax.random.normal(k_pos, (S_MEM, BATCH, D_MODEL), jnp.float32)

    params = make_params(k_par, D_MODEL)
    packed = pack_params(params)   # hoisted: done once at "model init"

    out = cross_attention_layer(tgt, memory, packed, pos=pos, query_pos=query_pos)
    out = jax.block_until_ready(out)

    ref = reference(tgt, memory, params, pos, query_pos)
    assert out.shape == (L_TGT, BATCH, D_MODEL)
    # Exact softmax normalization in-kernel + f32 matmuls on both sides:
    # observed error is ~1e-6; 1e-3 leaves ample margin.
    err = float(jnp.max(jnp.abs(out - ref)))
    assert jnp.allclose(out, ref, atol=1e-3, rtol=1e-3), err

    print("KERNEL_OK")
</pallas_src>

<mosaic_0001>
module attributes {stable_mosaic.version = 11 : i64} {
  func.func @kernel(%arg0: memref<96x32xf32, #tpu.memory_space<vmem>>, %arg1: memref<32x128xf32, #tpu.memory_space<vmem>>, %arg2: memref<6x32xf32, #tpu.memory_space<vmem>>, %arg3: memref<16x32xf32, #tpu.memory_space<vmem>>) attributes {dimension_semantics = [], scalar_prefetch = 0 : i64, scratch_operands = 0 : i64, tpu.core_type = #tpu.core_type<tc>} {
    %c0 = arith.constant 0 : index
    %c0_0 = arith.constant 0 : index
    %0 = vector.load %arg0[%c0, %c0_0] : memref<96x32xf32, #tpu.memory_space<vmem>>, vector<96x32xf32>
    %c0_1 = arith.constant 0 : index
    %c0_2 = arith.constant 0 : index
    %1 = vector.load %arg1[%c0_1, %c0_2] : memref<32x128xf32, #tpu.memory_space<vmem>>, vector<32x128xf32>
    %c0_3 = arith.constant 0 : index
    %c0_4 = arith.constant 0 : index
    %2 = vector.load %arg2[%c0_3, %c0_4] : memref<6x32xf32, #tpu.memory_space<vmem>>, vector<6x32xf32>
    %3 = vector.extract_strided_slice %0 {offsets = [0, 0], sizes = [16, 32], strides = [1, 1]} : vector<96x32xf32> to vector<16x32xf32>
    %4 = vector.extract_strided_slice %0 {offsets = [16, 0], sizes = [80, 32], strides = [1, 1]} : vector<96x32xf32> to vector<80x32xf32>
    %5 = vector.extract_strided_slice %1 {offsets = [0, 0], sizes = [32, 96], strides = [1, 1]} : vector<32x128xf32> to vector<32x96xf32>
    %cst = arith.constant dense<0.000000e+00> : vector<80x96xf32>
    %6 = tpu.matmul %4, %5, %cst {dimension_numbers = #tpu.dot_dimension_numbers<[1], [0], [0], [1], [0, 0, 1, 1], [], []>, precision = #tpu.contract_precision<fp32>} : vector<80x32xf32>, vector<32x96xf32>, vector<80x96xf32> -> vector<80x96xf32>
    %7 = vector.extract_strided_slice %6 {offsets = [0, 0], sizes = [16, 32], strides = [1, 1]} : vector<80x96xf32> to vector<16x32xf32>
    %8 = vector.extract_strided_slice %2 {offsets = [0, 0], sizes = [1, 32], strides = [1, 1]} : vector<6x32xf32> to vector<1x32xf32>
    %9 = vector.broadcast %8 : vector<1x32xf32> to vector<16x32xf32>
    %10 = arith.addf %7, %9 : vector<16x32xf32>
    %11 = vector.extract_strided_slice %6 {offsets = [16, 32], sizes = [32, 32], strides = [1, 1]} : vector<80x96xf32> to vector<32x32xf32>
    %12 = vector.extract_strided_slice %2 {offsets = [1, 0], sizes = [1, 32], strides = [1, 1]} : vector<6x32xf32> to vector<1x32xf32>
    %13 = vector.broadcast %12 : vector<1x32xf32> to vector<32x32xf32>
    %14 = arith.addf %11, %13 : vector<32x32xf32>
    %15 = vector.extract_strided_slice %6 {offsets = [48, 64], sizes = [32, 32], strides = [1, 1]} : vector<80x96xf32> to vector<32x32xf32>
    %16 = vector.extract_strided_slice %2 {offsets = [2, 0], sizes = [1, 32], strides = [1, 1]} : vector<6x32xf32> to vector<1x32xf32>
    %17 = vector.broadcast %16 : vector<1x32xf32> to vector<32x32xf32>
    %18 = arith.addf %15, %17 : vector<32x32xf32>
    %19 = vector.shape_cast %10 : vector<16x32xf32> to vector<2x8x32xf32>
    %20 = vector.shape_cast %14 : vector<32x32xf32> to vector<2x16x32xf32>
    %21 = vector.shape_cast %18 : vector<32x32xf32> to vector<2x16x32xf32>
    %22 = vector.extract_strided_slice %1 {offsets = [0, 96], sizes = [32, 32], strides = [1, 1]} : vector<32x128xf32> to vector<32x32xf32>
    %cst_5 = arith.constant 0.000000e+00 : f32
    %23 = vector.broadcast %cst_5 : f32 to vector<16x32xf32>
    %24 = vector.extract_strided_slice %19 {offsets = [0, 0, 0], sizes = [2, 8, 8], strides = [1, 1, 1]} : vector<2x8x32xf32> to vector<2x8x8xf32>
    %25 = vector.extract_strided_slice %20 {offsets = [0, 0, 0], sizes = [2, 16, 8], strides = [1, 1, 1]} : vector<2x16x32xf32> to vector<2x16x8xf32>
    %26 = vector.extract_strided_slice %21 {offsets = [0, 0, 0], sizes = [2, 16, 8], strides = [1, 1, 1]} : vector<2x16x32xf32> to vector<2x16x8xf32>
    "tpu.trace_start"() <{level = 10 : i32, message = "nld,nsd->nls"}> : () -> ()
    %cst_6 = arith.constant dense<0.000000e+00> : vector<2x8x16xf32>
    %27 = tpu.matmul %24, %25, %cst_6 {dimension_numbers = #tpu.dot_dimension_numbers<[2], [2], [1], [1], [0, 0, 0, 1, 1, 1], [0], [0]>, precision = #tpu.contract_precision<fp32>} : vector<2x8x8xf32>, vector<2x16x8xf32>, vector<2x8x16xf32> -> vector<2x8x16xf32>
    "tpu.trace_stop"() : () -> ()
    %cst_7 = arith.constant dense<0xFF800000> : vector<2x8xf32>
    %28 = vector.multi_reduction <maximumf>, %27, %cst_7 [2] : vector<2x8x16xf32> to vector<2x8xf32>
    %29 = vector.shape_cast %28 : vector<2x8xf32> to vector<2x8x1xf32>
    %30 = vector.broadcast %29 : vector<2x8x1xf32> to vector<2x8x16xf32>
    %31 = arith.subf %27, %30 : vector<2x8x16xf32>
    %32 = math.exp %31 : vector<2x8x16xf32>
    %cst_8 = arith.constant dense<0.000000e+00> : vector<2x8xf32>
    %33 = vector.multi_reduction <add>, %32, %cst_8 [2] : vector<2x8x16xf32> to vector<2x8xf32>
    %34 = vector.shape_cast %33 : vector<2x8xf32> to vector<2x8x1xf32>
    %35 = vector.broadcast %34 : vector<2x8x1xf32> to vector<2x8x16xf32>
    %36 = arith.divf %32, %35 : vector<2x8x16xf32>
    "tpu.trace_start"() <{level = 10 : i32, message = "nls,nsd->nld"}> : () -> ()
    %cst_9 = arith.constant dense<0.000000e+00> : vector<2x8x8xf32>
    %37 = tpu.matmul %36, %26, %cst_9 {dimension_numbers = #tpu.dot_dimension_numbers<[2], [1], [1], [2], [0, 0, 0, 1, 1, 2], [0], [0]>, precision = #tpu.contract_precision<fp32>} : vector<2x8x16xf32>, vector<2x16x8xf32>, vector<2x8x8xf32> -> vector<2x8x8xf32>
    "tpu.trace_stop"() : () -> ()
    %38 = vector.shape_cast %37 : vector<2x8x8xf32> to vector<16x8xf32>
    %39 = vector.extract_strided_slice %22 {offsets = [0, 0], sizes = [8, 32], strides = [1, 1]} : vector<32x32xf32> to vector<8x32xf32>
    %cst_10 = arith.constant dense<0.000000e+00> : vector<16x32xf32>
    %40 = tpu.matmul %38, %39, %cst_10 {dimension_numbers = #tpu.dot_dimension_numbers<[1], [0], [0], [1], [0, 0, 1, 1], [], []>, precision = #tpu.contract_precision<fp32>} : vector<16x8xf32>, vector<8x32xf32>, vector<16x32xf32> -> vector<16x32xf32>
    %41 = arith.addf %23, %40 : vector<16x32xf32>
    %42 = vector.extract_strided_slice %19 {offsets = [0, 0, 8], sizes = [2, 8, 8], strides = [1, 1, 1]} : vector<2x8x32xf32> to vector<2x8x8xf32>
    %43 = vector.extract_strided_slice %20 {offsets = [0, 0, 8], sizes = [2, 16, 8], strides = [1, 1, 1]} : vector<2x16x32xf32> to vector<2x16x8xf32>
    %44 = vector.extract_strided_slice %21 {offsets = [0, 0, 8], sizes = [2, 16, 8], strides = [1, 1, 1]} : vector<2x16x32xf32> to vector<2x16x8xf32>
    "tpu.trace_start"() <{level = 10 : i32, message = "nld,nsd->nls"}> : () -> ()
    %cst_11 = arith.constant dense<0.000000e+00> : vector<2x8x16xf32>
    %45 = tpu.matmul %42, %43, %cst_11 {dimension_numbers = #tpu.dot_dimension_numbers<[2], [2], [1], [1], [0, 0, 0, 1, 1, 1], [0], [0]>, precision = #tpu.contract_precision<fp32>} : vector<2x8x8xf32>, vector<2x16x8xf32>, vector<2x8x16xf32> -> vector<2x8x16xf32>
    "tpu.trace_stop"() : () -> ()
    %cst_12 = arith.constant dense<0xFF800000> : vector<2x8xf32>
    %46 = vector.multi_reduction <maximumf>, %45, %cst_12 [2] : vector<2x8x16xf32> to vector<2x8xf32>
    %47 = vector.shape_cast %46 : vector<2x8xf32> to vector<2x8x1xf32>
    %48 = vector.broadcast %47 : vector<2x8x1xf32> to vector<2x8x16xf32>
    %49 = arith.subf %45, %48 : vector<2x8x16xf32>
    %50 = math.exp %49 : vector<2x8x16xf32>
    %cst_13 = arith.constant dense<0.000000e+00> : vector<2x8xf32>
    %51 = vector.multi_reduction <add>, %50, %cst_13 [2] : vector<2x8x16xf32> to vector<2x8xf32>
    %52 = vector.shape_cast %51 : vector<2x8xf32> to vector<2x8x1xf32>
    %53 = vector.broadcast %52 : vector<2x8x1xf32> to vector<2x8x16xf32>
    %54 = arith.divf %50, %53 : vector<2x8x16xf32>
    "tpu.trace_start"() <{level = 10 : i32, message = "nls,nsd->nld"}> : () -> ()
    %cst_14 = arith.constant dense<0.000000e+00> : vector<2x8x8xf32>
    %55 = tpu.matmul %54, %44, %cst_14 {dimension_numbers = #tpu.dot_dimension_numbers<[2], [1], [1], [2], [0, 0, 0, 1, 1, 2], [0], [0]>, precision = #tpu.contract_precision<fp32>} : vector<2x8x16xf32>, vector<2x16x8xf32>, vector<2x8x8xf32> -> vector<2x8x8xf32>
    "tpu.trace_stop"() : () -> ()
    %56 = vector.shape_cast %55 : vector<2x8x8xf32> to vector<16x8xf32>
    %57 = vector.extract_strided_slice %22 {offsets = [8, 0], sizes = [8, 32], strides = [1, 1]} : vector<32x32xf32> to vector<8x32xf32>
    %cst_15 = arith.constant dense<0.000000e+00> : vector<16x32xf32>
    %58 = tpu.matmul %56, %57, %cst_15 {dimension_numbers = #tpu.dot_dimension_numbers<[1], [0], [0], [1], [0, 0, 1, 1], [], []>, precision = #tpu.contract_precision<fp32>} : vector<16x8xf32>, vector<8x32xf32>, vector<16x32xf32> -> vector<16x32xf32>
    %59 = arith.addf %41, %58 : vector<16x32xf32>
    %60 = vector.extract_strided_slice %19 {offsets = [0, 0, 16], sizes = [2, 8, 8], strides = [1, 1, 1]} : vector<2x8x32xf32> to vector<2x8x8xf32>
    %61 = vector.extract_strided_slice %20 {offsets = [0, 0, 16], sizes = [2, 16, 8], strides = [1, 1, 1]} : vector<2x16x32xf32> to vector<2x16x8xf32>
    %62 = vector.extract_strided_slice %21 {offsets = [0, 0, 16], sizes = [2, 16, 8], strides = [1, 1, 1]} : vector<2x16x32xf32> to vector<2x16x8xf32>
    "tpu.trace_start"() <{level = 10 : i32, message = "nld,nsd->nls"}> : () -> ()
    %cst_16 = arith.constant dense<0.000000e+00> : vector<2x8x16xf32>
    %63 = tpu.matmul %60, %61, %cst_16 {dimension_numbers = #tpu.dot_dimension_numbers<[2], [2], [1], [1], [0, 0, 0, 1, 1, 1], [0], [0]>, precision = #tpu.contract_precision<fp32>} : vector<2x8x8xf32>, vector<2x16x8xf32>, vector<2x8x16xf32> -> vector<2x8x16xf32>
    "tpu.trace_stop"() : () -> ()
    %cst_17 = arith.constant dense<0xFF800000> : vector<2x8xf32>
    %64 = vector.multi_reduction <maximumf>, %63, %cst_17 [2] : vector<2x8x16xf32> to vector<2x8xf32>
    %65 = vector.shape_cast %64 : vector<2x8xf32> to vector<2x8x1xf32>
    %66 = vector.broadcast %65 : vector<2x8x1xf32> to vector<2x8x16xf32>
    %67 = arith.subf %63, %66 : vector<2x8x16xf32>
    %68 = math.exp %67 : vector<2x8x16xf32>
    %cst_18 = arith.constant dense<0.000000e+00> : vector<2x8xf32>
    %69 = vector.multi_reduction <add>, %68, %cst_18 [2] : vector<2x8x16xf32> to vector<2x8xf32>
    %70 = vector.shape_cast %69 : vector<2x8xf32> to vector<2x8x1xf32>
    %71 = vector.broadcast %70 : vector<2x8x1xf32> to vector<2x8x16xf32>
    %72 = arith.divf %68, %71 : vector<2x8x16xf32>
    "tpu.trace_start"() <{level = 10 : i32, message = "nls,nsd->nld"}> : () -> ()
    %cst_19 = arith.constant dense<0.000000e+00> : vector<2x8x8xf32>
    %73 = tpu.matmul %72, %62, %cst_19 {dimension_numbers = #tpu.dot_dimension_numbers<[2], [1], [1], [2], [0, 0, 0, 1, 1, 2], [0], [0]>, precision = #tpu.contract_precision<fp32>} : vector<2x8x16xf32>, vector<2x16x8xf32>, vector<2x8x8xf32> -> vector<2x8x8xf32>
    "tpu.trace_stop"() : () -> ()
    %74 = vector.shape_cast %73 : vector<2x8x8xf32> to vector<16x8xf32>
    %75 = vector.extract_strided_slice %22 {offsets = [16, 0], sizes = [8, 32], strides = [1, 1]} : vector<32x32xf32> to vector<8x32xf32>
    %cst_20 = arith.constant dense<0.000000e+00> : vector<16x32xf32>
    %76 = tpu.matmul %74, %75, %cst_20 {dimension_numbers = #tpu.dot_dimension_numbers<[1], [0], [0], [1], [0, 0, 1, 1], [], []>, precision = #tpu.contract_precision<fp32>} : vector<16x8xf32>, vector<8x32xf32>, vector<16x32xf32> -> vector<16x32xf32>
    %77 = arith.addf %59, %76 : vector<16x32xf32>
    %78 = vector.extract_strided_slice %19 {offsets = [0, 0, 24], sizes = [2, 8, 8], strides = [1, 1, 1]} : vector<2x8x32xf32> to vector<2x8x8xf32>
    %79 = vector.extract_strided_slice %20 {offsets = [0, 0, 24], sizes = [2, 16, 8], strides = [1, 1, 1]} : vector<2x16x32xf32> to vector<2x16x8xf32>
    %80 = vector.extract_strided_slice %21 {offsets = [0, 0, 24], sizes = [2, 16, 8], strides = [1, 1, 1]} : vector<2x16x32xf32> to vector<2x16x8xf32>
    "tpu.trace_start"() <{level = 10 : i32, message = "nld,nsd->nls"}> : () -> ()
    %cst_21 = arith.constant dense<0.000000e+00> : vector<2x8x16xf32>
    %81 = tpu.matmul %78, %79, %cst_21 {dimension_numbers = #tpu.dot_dimension_numbers<[2], [2], [1], [1], [0, 0, 0, 1, 1, 1], [0], [0]>, precision = #tpu.contract_precision<fp32>} : vector<2x8x8xf32>, vector<2x16x8xf32>, vector<2x8x16xf32> -> vector<2x8x16xf32>
    "tpu.trace_stop"() : () -> ()
    %cst_22 = arith.constant dense<0xFF800000> : vector<2x8xf32>
    %82 = vector.multi_reduction <maximumf>, %81, %cst_22 [2] : vector<2x8x16xf32> to vector<2x8xf32>
    %83 = vector.shape_cast %82 : vector<2x8xf32> to vector<2x8x1xf32>
    %84 = vector.broadcast %83 : vector<2x8x1xf32> to vector<2x8x16xf32>
    %85 = arith.subf %81, %84 : vector<2x8x16xf32>
    %86 = math.exp %85 : vector<2x8x16xf32>
    %cst_23 = arith.constant dense<0.000000e+00> : vector<2x8xf32>
    %87 = vector.multi_reduction <add>, %86, %cst_23 [2] : vector<2x8x16xf32> to vector<2x8xf32>
    %88 = vector.shape_cast %87 : vector<2x8xf32> to vector<2x8x1xf32>
    %89 = vector.broadcast %88 : vector<2x8x1xf32> to vector<2x8x16xf32>
    %90 = arith.divf %86, %89 : vector<2x8x16xf32>
    "tpu.trace_start"() <{level = 10 : i32, message = "nls,nsd->nld"}> : () -> ()
    %cst_24 = arith.constant dense<0.000000e+00> : vector<2x8x8xf32>
    %91 = tpu.matmul %90, %80, %cst_24 {dimension_numbers = #tpu.dot_dimension_numbers<[2], [1], [1], [2], [0, 0, 0, 1, 1, 2], [0], [0]>, precision = #tpu.contract_precision<fp32>} : vector<2x8x16xf32>, vector<2x16x8xf32>, vector<2x8x8xf32> -> vector<2x8x8xf32>
    "tpu.trace_stop"() : () -> ()
    %92 = vector.shape_cast %91 : vector<2x8x8xf32> to vector<16x8xf32>
    %93 = vector.extract_strided_slice %22 {offsets = [24, 0], sizes = [8, 32], strides = [1, 1]} : vector<32x32xf32> to vector<8x32xf32>
    %cst_25 = arith.constant dense<0.000000e+00> : vector<16x32xf32>
    %94 = tpu.matmul %92, %93, %cst_25 {dimension_numbers = #tpu.dot_dimension_numbers<[1], [0], [0], [1], [0, 0, 1, 1], [], []>, precision = #tpu.contract_precision<fp32>} : vector<16x8xf32>, vector<8x32xf32>, vector<16x32xf32> -> vector<16x32xf32>
    %95 = arith.addf %77, %94 : vector<16x32xf32>
    %96 = vector.extract_strided_slice %2 {offsets = [3, 0], sizes = [1, 32], strides = [1, 1]} : vector<6x32xf32> to vector<1x32xf32>
    %97 = vector.broadcast %96 : vector<1x32xf32> to vector<16x32xf32>
    %98 = arith.addf %95, %97 : vector<16x32xf32>
    %99 = arith.addf %3, %98 : vector<16x32xf32>
    %cst_26 = arith.constant dense<0.000000e+00> : vector<16xf32>
    %100 = vector.multi_reduction <add>, %99, %cst_26 [1] : vector<16x32xf32> to vector<16xf32>
    %101 = vector.shape_cast %100 : vector<16xf32> to vector<16x1xf32>
    %cst_27 = arith.constant 3.200000e+01 : f32
    %102 = vector.broadcast %cst_27 : f32 to vector<16x1xf32>
    %103 = arith.divf %101, %102 : vector<16x1xf32>
    %104 = vector.broadcast %103 : vector<16x1xf32> to vector<16x32xf32>
    %105 = arith.subf %99, %104 : vector<16x32xf32>
    %106 = arith.mulf %105, %105 : vector<16x32xf32>
    %cst_28 = arith.constant dense<0.000000e+00> : vector<16xf32>
    %107 = vector.multi_reduction <add>, %106, %cst_28 [1] : vector<16x32xf32> to vector<16xf32>
    %108 = vector.shape_cast %107 : vector<16xf32> to vector<16x1xf32>
    %cst_29 = arith.constant 3.200000e+01 : f32
    %109 = vector.broadcast %cst_29 : f32 to vector<16x1xf32>
    %110 = arith.divf %108, %109 : vector<16x1xf32>
    %111 = vector.broadcast %103 : vector<16x1xf32> to vector<16x32xf32>
    %112 = arith.subf %99, %111 : vector<16x32xf32>
    %cst_30 = arith.constant 9.99999974E-6 : f32
    %113 = vector.broadcast %cst_30 : f32 to vector<16x1xf32>
    %114 = arith.addf %110, %113 : vector<16x1xf32>
    %115 = math.rsqrt %114 : vector<16x1xf32>
    %116 = vector.broadcast %115 : vector<16x1xf32> to vector<16x32xf32>
    %117 = arith.mulf %112, %116 : vector<16x32xf32>
    %118 = vector.extract_strided_slice %2 {offsets = [4, 0], sizes = [1, 32], strides = [1, 1]} : vector<6x32xf32> to vector<1x32xf32>
    %119 = vector.broadcast %118 : vector<1x32xf32> to vector<16x32xf32>
    %120 = arith.mulf %117, %119 : vector<16x32xf32>
    %121 = vector.extract_strided_slice %2 {offsets = [5, 0], sizes = [1, 32], strides = [1, 1]} : vector<6x32xf32> to vector<1x32xf32>
    %122 = vector.broadcast %121 : vector<1x32xf32> to vector<16x32xf32>
    %123 = arith.addf %120, %122 : vector<16x32xf32>
    %c0_31 = arith.constant 0 : index
    %c0_32 = arith.constant 0 : index
    %124 = vector.load %arg3[%c0_31, %c0_32] : memref<16x32xf32, #tpu.memory_space<vmem>>, vector<16x32xf32>
    tpu.vector_store %arg3[%c0_31, %c0_32], %123 {strides = array<i32>} : memref<16x32xf32, #tpu.memory_space<vmem>>, vector<16x32xf32>,
    return
  }
}

</mosaic_0001>

<bundles_post_ra>
// kernel: _cross_attention_jit.1
= control target key start
LH: loop header
LB: loop body
LE: loop exit
PB: predicated region body
PF: predicated region fallthrough
CT: control target
= control target key end

     0   :  { %vm31_vm0 = vcmask 261120   ;;  %s4343_s15 = smov 32   ;;  %s4344_s16 = smov 96   ;;  %vm553_vm1 = vcmask 64512   ;;  %vm892_vm2 = vcmask 130048   ;;  %s4994_s1 = inlined_call_operand.vmem [shape: f32[32,128], index: 1, kind: input, shape index: {}]   ;;  %s4995_s0 = inlined_call_operand.vmem [shape: f32[96,32], index: 0, kind: input, shape index: {}]   ;;  %s4996_s2 = inlined_call_operand.vmem [shape: f32[6,32], index: 2, kind: input, shape index: {}]   ;;  %s4997_s3 = inlined_call_operand.vmem [shape: f32[16,32], index: 3, kind: output, shape index: {}]  }
   0x1   :  { %v29_v0 = vld [vmem:[%s4994_s1 + $0x18] sm:$0xff]  ;;  %v28_v1 = vld [vmem:[%s4994_s1 + $0x10] sm:$0xff]  ;;  %v27_v2 = vld [vmem:[%s4994_s1 + $0x8] sm:$0xff]  ;;  %s4345_s17 = smov 64   ;;  %s4346_s18 = smov 88  }
   0x2   :  { %v4385_v3 = vand.u32 4294901760, %v29_v0  ;;  %v4387_v4 = vand.u32 4294901760, %v28_v1  ;;  %v4389_v5 = vand.u32 4294901760, %v27_v2  ;;  %v26_v6 = vld [vmem:[%s4994_s1] sm:$0xff]  ;;  %v16_v7 = vld [vmem:[%s4995_s0 + $0x10] sm:$0xff]  ;;  %v25_v8 = vld [vmem:[%s4995_s0 + $0x58] sm:$0xff] }
   0x3   :  { %v4400_v9 = vand.u32 4294901760, %v26_v6  ;;  %v33_v10 = vsel %vm31_vm0, %v16_v7, 0  ;;  %v60_v11 = vsel %vm31_vm0, %v25_v8, 0  ;;  %v17_v12 = vld [vmem:[%s4995_s0 + $0x18] sm:$0xff]  ;;  %v18_v17 = vld [vmem:[%s4995_s0 + $0x20] sm:$0xff]  ;;  %v19_v44 = vld [vmem:[%s4995_s0 + $0x28] sm:$0xff] }
   0x4   :  { %75 = vmatpush.msra.mxu0 %v4385_v3  ;;  %4279 = vmatpush.msra.mxu2 %v4385_v3  ;;  %v176_v13 = vsub.f32 %v29_v0, %v4385_v3  ;;  %v4410_v14 = vand.u32 4294901760, %v33_v10  ;;  %v4412_v15 = vand.u32 4294901760, %v60_v11  ;;  %v182_v16 = vsub.f32 %v28_v1, %v4387_v4  ;;  %v20_v53 = vld [vmem:[%s4995_s0 + $0x30] sm:$0xff]  ;;  %v21_v60 = vld [vmem:[%s4995_s0 + $0x38] sm:$0xff]  ;;  %s4347_s19 = smov 120   ;;  %s4348_s20 = smov 56  }
   0x5   :  { %v188_v18 = vsub.f32 %v27_v2, %v4389_v5  ;;  %v194_v19 = vsub.f32 %v26_v6, %v4400_v9  ;;  %v36_v20 = vsel %vm31_vm0, %v17_v12, 0  ;;  %v39_v28 = vsel %vm31_vm0, %v18_v17, 0  ;;  %s4349_s23 = smov 112   ;;  %s4350_s24 = smov 48  }
   0x6   :  { %77 = vmatpush.msra.mxu0 %v4387_v4  ;;  %4280 = vmatpush.msra.mxu2 %v4387_v4  ;;  %v177_v21 = vand.u32 4294901760, %v176_v13  ;;  %v4424_v22 = vsub.f32 %v33_v10, %v4410_v14  ;;  %v4427_v23 = vsub.f32 %v60_v11, %v4412_v15  ;;  %v183_v24 = vand.u32 4294901760, %v182_v16  ;;  %v23_v10 = vld [vmem:[%s4995_s0 + $0x48] sm:$0xff]  ;;  %s4351_s27 = smov 80   ;;  %s4352_s30 = smov 104  }
   0x7   :  { %v189_v25 = vand.u32 4294901760, %v188_v18  ;;  %v195_v26 = vand.u32 4294901760, %v194_v19  ;;  %v4429_v27 = vand.u32 4294901760, %v36_v20  ;;  %v4445_v38 = vand.u32 4294901760, %v39_v28  ;;  %s4353_s4 = smov 72   ;;  %s4354_s5 = smov 40  }
   0x8   :  { %79 = vmatpush.msra.mxu0 %v4389_v5  ;;  %4281 = vmatpush.msra.mxu2 %v4389_v5  ;;  %v178_v29 = vsub.f32 %v176_v13, %v177_v21  ;;  %v84_v30 = vand.u32 4294901760, %v4424_v22  ;;  %v156_v31 = vand.u32 4294901760, %v4427_v23  ;;  %v184_v32 = vsub.f32 %v182_v16, %v183_v24 }
   0x9   :  { %v190_v33 = vsub.f32 %v188_v18, %v189_v25  ;;  %v4437_v34 = vsub.f32 %v36_v20, %v4429_v27  ;;  %v196_v40 = vsub.f32 %v194_v19, %v195_v26  ;;  %v99_v47 = vsub.f32 %v39_v28, %v4445_v38 }
   0xa   :  { %81 = vmatpush.msra.mxu0 %v4400_v9  ;;  %4282 = vmatpush.msra.mxu2 %v4400_v9  ;;  %v179_v35 = vand.u32 4294901760, %v178_v29  ;;  %v85_v36 = vsub.f32 %v4424_v22, %v84_v30  ;;  %v157_v37 = vsub.f32 %v4427_v23, %v156_v31  ;;  %v185_v39 = vand.u32 4294901760, %v184_v32 }
   0xb   :  { %v92_v41 = vand.u32 4294901760, %v4437_v34  ;;  %v191_v45 = vand.u32 4294901760, %v190_v33  ;;  %v197_v48 = vand.u32 4294901760, %v196_v40  ;;  %v42_v49 = vsel %vm31_vm0, %v19_v44, 0 }
   0xc   :  { %254 = vmatpush.msrb.mxu2 %v176_v13  ;;  %411 = vmatpush.msrb.mxu0 %v177_v21  ;;  %v86_v42 = vand.u32 4294901760, %v85_v36  ;;  %v158_v43 = vand.u32 4294901760, %v157_v37  ;;  %v100_v51 = vand.u32 4294901760, %v99_v47  ;;  %v4454_v52 = vand.u32 4294901760, %v42_v49 }
   0xd   :  { %180 = vmatpush.msra.mxu1 %v179_v35  ;;  %4283 = vmatpush.msra.mxu3 %v179_v35  ;;  %v93_v46 = vsub.f32 %v4437_v34, %v92_v41  ;;  %v45_v56 = vsel %vm31_vm0, %v20_v53, 0  ;;  %v48_v63 = vsel %vm31_vm0, %v21_v60, 0  ;;  %v54_v13 = vsel %vm31_vm0, %v23_v10, 0  ;;  %v4508_v35 = vld [vmem:[%s4996_s2] sm:$0x3f] }
   0xe   :  { %257 = vmatpush.msrb.mxu2 %v182_v16  ;;  %415 = vmatpush.msrb.mxu0 %v183_v24  ;;  %v101_v54 = vsub.f32 %v99_v47, %v100_v51  ;;  %v107_v55 = vsub.f32 %v42_v49, %v4454_v52  ;;  %v4470_v59 = vand.u32 4294901760, %v45_v56  ;;  %v4481_v2 = vand.u32 4294901760, %v48_v63 }
   0xf   :  { %87 = vmatmul.f32.vlgmr.msra.gmra.mxu0 %v86_v42  ;;  %159 = vmatmul.f32.vlgmr.msra.gmra.mxu2 %v158_v43  ;;  %v94_v50 = vand.u32 4294901760, %v93_v46  ;;  %v529_v36 = vperm.slane %v4508_v35, 1 }
  0x10   :  { %186 = vmatpush.msra.mxu1 %v185_v39  ;;  %4284 = vmatpush.msra.mxu3 %v185_v39  ;;  %v102_v57 = vand.u32 4294901760, %v101_v54  ;;  %v108_v58 = vand.u32 4294901760, %v107_v55  ;;  %v115_v62 = vsub.f32 %v45_v56, %v4470_v59 }
  0x11   :  { %260 = vmatpush.msrb.mxu2 %v188_v18  ;;  %419 = vmatpush.msrb.mxu0 %v189_v25  ;;  %v138_v18 = vand.u32 4294901760, %v54_v13 }
  0x12   :  { %192 = vmatpush.msra.mxu1 %v191_v45  ;;  %4285 = vmatpush.msra.mxu3 %v191_v45  ;;  %v109_v61 = vsub.f32 %v107_v55, %v108_v58  ;;  %v116_v1 = vand.u32 4294901760, %v115_v62 }
  0x13   :  { %263 = vmatpush.msrb.mxu2 %v194_v19  ;;  %423 = vmatpush.msrb.mxu0 %v195_v26  ;;  %v24_v19 = vld [vmem:[%s4995_s0 + $0x50] sm:$0xff]  ;;  %v139_v21 = vsub.f32 %v54_v13, %v138_v18 }
  0x14   :  { %198 = vmatpush.msra.mxu1 %v197_v48  ;;  %4286 = vmatpush.msra.mxu3 %v197_v48  ;;  %v110_v0 = vand.u32 4294901760, %v109_v61 }
  0x15   :  { %200 = vmatmul.f32.vlgmr.msra.gmra.mxu1 %v4410_v14  ;;  %236 = vmatmul.f32.vlgmr.msra.gmra.mxu3 %v4412_v15  ;;  %v140_v25 = vand.u32 4294901760, %v139_v21 }
  0x16   :  { %328 = vmatpush.msrb.mxu3 %v4385_v3  ;;  %478 = vmatpush.msrb.mxu1 %v4385_v3  ;;  %v22_v3 = vld [vmem:[%s4995_s0 + $0x40] sm:$0xff] }
  0x17   :  { %95 = vmatmul.f32.gmra.mxu0 %v94_v50  ;;  %266 = vmatmul.f32.vlgmr.msrb.gmra.mxu2 %v4424_v22  ;;  %v51_v6 = vsel %vm31_vm0, %v22_v3, 0  ;;  %v57_v22 = vsel %vm31_vm0, %v24_v19, 0  ;;  %v141_v28 = vsub.f32 %v139_v21, %v140_v25 }
  0x18   :  { %330 = vmatpush.msrb.mxu3 %v4387_v4  ;;  %480 = vmatpush.msrb.mxu1 %v4387_v4  ;;  %v117_v4 = vsub.f32 %v115_v62, %v116_v1  ;;  %v146_v26 = vand.u32 4294901760, %v57_v22 }
  0x19   :  { %531 = vrot.lane.b32.xlu0 %v529_v36, %s4343_s15 }
  0x1a   :  { %332 = vmatpush.msrb.mxu3 %v4389_v5  ;;  %482 = vmatpush.msrb.mxu1 %v4389_v5  ;;  %v123_v5 = vsub.f32 %v48_v63, %v4481_v2  ;;  %v118_v7 = vand.u32 4294901760, %v117_v4  ;;  %v147_v29 = vsub.f32 %v57_v22, %v146_v26 }
  0x1c   :  { %334 = vmatpush.msrb.mxu3 %v4400_v9  ;;  %484 = vmatpush.msrb.mxu1 %v4400_v9  ;;  %v124_v8 = vand.u32 4294901760, %v123_v5  ;;  %v4489_v9 = vand.u32 4294901760, %v51_v6  ;;  %v148_v32 = vand.u32 4294901760, %v147_v29 }
  0x1d   :  { %204 = vmatmul.f32.gmra.mxu1 %v4429_v27  ;;  %338 = vmatmul.f32.vlgmr.msrb.gmra.mxu3 %v84_v30  ;;  %v142_v30 = vand.u32 4294901760, %v141_v28 }
  0x1e   :  { %v125_v11 = vsub.f32 %v123_v5, %v124_v8  ;;  %v131_v12 = vsub.f32 %v51_v6, %v4489_v9  ;;  %v149_v33 = vsub.f32 %v147_v29, %v148_v32 }
  0x1f   :  { %103 = vmatmul.f32.gmra.mxu0 %v102_v57  ;;  %271 = vmatmul.f32.gmra.mxu2 %v4437_v34 }
  0x20   :  { %v126_v16 = vand.u32 4294901760, %v125_v11  ;;  %v132_v17 = vand.u32 4294901760, %v131_v12  ;;  %v150_v34 = vand.u32 4294901760, %v149_v33 }
  0x22   :  { %v133_v20 = vsub.f32 %v131_v12, %v132_v17 }
  0x24   :  { %v134_v24 = vand.u32 4294901760, %v133_v20 }
  0x25   :  { %208 = vmatmul.f32.gmra.mxu1 %v4445_v38  ;;  %344 = vmatmul.f32.gmra.mxu3 %v92_v41 }
  0x27   :  { %111 = vmatmul.f32.gmra.mxu0 %v110_v0  ;;  %276 = vmatmul.f32.gmra.mxu2 %v99_v47 }
  0x2d   :  { %212 = vmatmul.f32.gmra.mxu1 %v4454_v52  ;;  %350 = vmatmul.f32.gmra.mxu3 %v100_v51 }
  0x2f   :  { %119 = vmatmul.f32.gmra.mxu0 %v118_v7  ;;  %281 = vmatmul.f32.gmra.mxu2 %v107_v55 }
  0x35   :  { %216 = vmatmul.f32.gmra.mxu1 %v4470_v59  ;;  %356 = vmatmul.f32.gmra.mxu3 %v108_v58 }
  0x37   :  { %127 = vmatmul.f32.gmra.mxu0 %v126_v16  ;;  %286 = vmatmul.f32.gmra.mxu2 %v115_v62 }
  0x3d   :  { %220 = vmatmul.f32.gmra.mxu1 %v4481_v2  ;;  %362 = vmatmul.f32.gmra.mxu3 %v116_v1 }
  0x3f   :  { %135 = vmatmul.f32.gmra.mxu0 %v134_v24  ;;  %291 = vmatmul.f32.gmra.mxu2 %v123_v5 }
  0x45   :  { %224 = vmatmul.f32.gmra.mxu1 %v4489_v9  ;;  %368 = vmatmul.f32.gmra.mxu3 %v124_v8 }
  0x47   :  { %143 = vmatmul.f32.gmra.mxu0 %v142_v30  ;;  %296 = vmatmul.f32.gmra.mxu2 %v131_v12 }
  0x4d   :  { %228 = vmatmul.f32.gmra.mxu1 %v138_v18  ;;  %374 = vmatmul.f32.gmra.mxu3 %v132_v17 }
  0x4f   :  { %151 = vmatmul.f32.gmra.mxu0 %v150_v34  ;;  %301 = vmatmul.f32.gmra.mxu2 %v139_v21 }
  0x55   :  { %232 = vmatmul.f32.gmra.mxu1 %v146_v26  ;;  %380 = vmatmul.f32.gmra.mxu3 %v140_v25 }
  0x57   :  { %306 = vmatmul.f32.gmra.mxu2 %v147_v29  ;;  %425 = vmatmul.f32.vlgmr.msrb.gmra.mxu0 %v4410_v14 }
  0x5d   :  { %386 = vmatmul.f32.gmra.mxu3 %v148_v32  ;;  %486 = vmatmul.f32.vlgmr.msrb.gmra.mxu1 %v4410_v14 }
  0x5f   :  { %311 = vmatmul.f32.gmra.mxu2 %v4427_v23  ;;  %429 = vmatmul.f32.gmra.mxu0 %v4429_v27 }
  0x65   :  { %392 = vmatmul.f32.gmra.mxu3 %v156_v31  ;;  %490 = vmatmul.f32.gmra.mxu1 %v4429_v27 }
  0x67   :  { %433 = vmatmul.f32.gmra.mxu0 %v4445_v38 }
  0x6d   :  { %494 = vmatmul.f32.gmra.mxu1 %v4445_v38 }
  0x6f   :  { %437 = vmatmul.f32.gmra.mxu0 %v4454_v52 }
  0x75   :  { %498 = vmatmul.f32.gmra.mxu1 %v4454_v52 }
  0x77   :  { %441 = vmatmul.f32.gmra.mxu0 %v4470_v59 }
  0x7d   :  { %502 = vmatmul.f32.gmra.mxu1 %v4470_v59 }
  0x7f   :  { %445 = vmatmul.f32.gmra.mxu0 %v4481_v2 }
  0x85   :  { %506 = vmatmul.f32.gmra.mxu1 %v4481_v2 }
  0x87   :  { %449 = vmatmul.f32.gmra.mxu0 %v4489_v9 }
  0x8b   :  { %v532_v6 = vpop.permute.xlu0 %531 }
  0x8c   :  { %v4527_v14 = vpop.f32.mrf.mxu0 }
  0x8d   :  { %510 = vmatmul.f32.gmra.mxu1 %v4489_v9 }
  0x8f   :  { %453 = vmatmul.f32.gmra.mxu0 %v138_v18 }
  0x92   :  { %v4530_v23 = vpop.f32.mrf.mxu1  ;;  %v4540_v46 = vpop.f32.mrf.mxu2 }
  0x94   :  { %v4532_v27 = vpop.f32.mrf.mxu0 }
  0x95   :  { %514 = vmatmul.f32.gmra.mxu1 %v138_v18 }
  0x97   :  { %457 = vmatmul.f32.gmra.mxu0 %v146_v26 }
  0x98   :  { %v4542_v47 = vpop.f32.mrf.mxu3 }
  0x9a   :  { %v4534_v31 = vpop.f32.mrf.mxu1  ;;  %v267_v50 = vpop.f32.mrf.mxu2 }
  0x9c   :  { %v104_v37 = vpop.f32.mrf.mxu0 }
  0x9d   :  { %518 = vmatmul.f32.gmra.mxu1 %v146_v26 }
  0x9f   :  { %461 = vmatmul.f32.gmra.mxu0 %v4412_v15 }
  0xa0   :  { %v339_v51 = vpop.f32.mrf.mxu3 }
  0xa2   :  { %v209_v38 = vpop.f32.mrf.mxu1  ;;  %v4552_v53 = vpop.f32.mrf.mxu2 }
  0xa3   :  { %v210_v62 = vadd.f32 %v209_v38, %v104_v37 }
  0xa4   :  { %v112_v39 = vpop.f32.mrf.mxu0 }
  0xa5   :  { %522 = vmatmul.f32.gmra.mxu1 %v4412_v15 }
  0xa8   :  { %v4556_v55 = vpop.f32.mrf.mxu3 }
  0xaa   :  { %v213_v40 = vpop.f32.mrf.mxu1  ;;  %v277_v58 = vpop.f32.mrf.mxu2 }
  0xab   :  { %v278_v0 = vadd.f32 %v277_v58, %v210_v62  ;;  %v214_v7 = vadd.f32 %v213_v40, %v112_v39  ;;  %v538_v58 = vperm.slane %v4508_v35, 2 }
  0xac   :  { %v120_v41 = vpop.f32.mrf.mxu0 }
  0xb0   :  { %v351_v60 = vpop.f32.mrf.mxu3 }
  0xb1   :  { %v352_v2 = vadd.f32 %v351_v60, %v278_v0  ;;  %v526_v0 = vperm.slane %v4508_v35, 0 }
  0xb2   :  { %v217_v42 = vpop.f32.mrf.mxu1  ;;  %v282_v1 = vpop.f32.mrf.mxu2 }
  0xb3   :  { %v283_v10 = vadd.f32 %v282_v1, %v214_v7  ;;  %v218_v19 = vadd.f32 %v217_v42, %v120_v41 }
  0xb4   :  { %v128_v43 = vpop.f32.mrf.mxu0 }
  0xb8   :  { %v357_v3 = vpop.f32.mrf.mxu3 }
  0xb9   :  { %v358_v12 = vadd.f32 %v357_v3, %v283_v10 }
  0xba   :  { %v221_v44 = vpop.f32.mrf.mxu1  ;;  %v287_v13 = vpop.f32.mrf.mxu2 }
  0xbb   :  { %v288_v22 = vadd.f32 %v287_v13, %v218_v19  ;;  %v222_v30 = vadd.f32 %v221_v44, %v128_v43  ;;  %v202_v43 = vadd.f32 %v4530_v23, %v4527_v14  ;;  %v206_v14 = vadd.f32 %v4534_v31, %v4532_v27 }
  0xbc   :  { %v4538_v45 = vpop.f32.mrf.mxu0 }
  0xbd   :  { %v268_v44 = vadd.f32 %v267_v50, %v202_v43  ;;  %v273_v50 = vadd.f32 %v4552_v53, %v206_v14 }
  0xbf   :  { %v340_v60 = vadd.f32 %v339_v51, %v268_v44 }
  0xc0   :  { %v363_v17 = vpop.f32.mrf.mxu3 }
  0xc1   :  { %v364_v25 = vadd.f32 %v363_v17, %v288_v22 }
  0xc2   :  { %v4544_v48 = vpop.f32.mrf.mxu1  ;;  %v292_v28 = vpop.f32.mrf.mxu2 }
  0xc3   :  { %v293_v34 = vadd.f32 %v292_v28, %v222_v30 }
  0xc4   :  { %v4546_v49 = vpop.f32.mrf.mxu0 }
  0xc8   :  { %v369_v33 = vpop.f32.mrf.mxu3 }
  0xc9   :  { %v370_v38 = vadd.f32 %v369_v33, %v293_v34 }
  0xca   :  { %v4548_v52 = vpop.f32.mrf.mxu1  ;;  %v297_v44 = vpop.f32.mrf.mxu2 }
  0xcc   :  { %v4550_v15 = vpop.f32.mrf.mxu0 }
  0xd2   :  { %v4554_v54 = vpop.f32.mrf.mxu1 }
  0xd4   :  { %v426_v56 = vpop.f32.mrf.mxu0 }
  0xd5   :  { %v427_v62 = vadd.f32 %v426_v56, %v340_v60  ;;  %v375_v60 = vpop.f32.mrf.mxu3 }
  0xda   :  { %v487_v57 = vpop.f32.mrf.mxu1 }
  0xdc   :  { %v4558_v59 = vpop.f32.mrf.mxu0 }
  0xe2   :  { %v4560_v61 = vpop.f32.mrf.mxu1 }
  0xe4   :  { %v434_v63 = vpop.f32.mrf.mxu0 }
  0xe5   :  { %v435_v4 = vadd.f32 %v434_v63, %v352_v2  ;;  %v488_v63 = vadd.f32 %v487_v57, %v427_v62  ;;  %v346_v57 = vadd.f32 %v4556_v55, %v273_v50  ;;  %v302_v62 = vpop.f32.mrf.mxu2 }
  0xe7   :  { %v4579_v1 = vadd.f32 %v526_v0, %v488_v63  ;;  %v381_v63 = vpop.f32.mrf.mxu3 }
  0xe9   :  { %v555_v2 = vsel %vm553_vm1, %v4579_v1, 0 }
  0xea   :  { %v495_v5 = vpop.f32.mrf.mxu1 }
  0xeb   :  { %v496_v8 = vadd.f32 %v495_v5, %v435_v4  ;;  %v4583_v4 = vand.u32 4294901760, %v555_v2 }
  0xec   :  { %v438_v9 = vpop.f32.mrf.mxu0 }
  0xed   :  { %v4562_v11 = vadd.f32 %v532_v6, %v496_v8  ;;  %v439_v16 = vadd.f32 %v438_v9, %v358_v12  ;;  %v431_v9 = vadd.f32 %v4558_v59, %v346_v57 }
  0xef   :  { %549 = vrot.lane.b32.xlu1 %v4562_v11, %s4344_s16  ;;  %v492_v13 = vadd.f32 %v4560_v61, %v431_v9 }
  0xf2   :  { %v499_v18 = vpop.f32.mrf.mxu1 }
  0xf3   :  { %v500_v20 = vadd.f32 %v499_v18, %v439_v16  ;;  %v4594_v18 = vadd.f32 %v526_v0, %v492_v13  ;;  %v4603_v0 = vpop.f32.mrf.mxu2 }
  0xf4   :  { %v442_v21 = vpop.f32.mrf.mxu0 }
  0xf5   :  { %v4565_v24 = vadd.f32 %v532_v6, %v500_v20  ;;  %v443_v26 = vadd.f32 %v442_v21, %v364_v25  ;;  %v727_v59 = vsel %vm553_vm1, %v4594_v18, 0 }
  0xf6   :  { %v751_v25 = vand.u32 4294901760, %v727_v59 }
  0xf7   :  { %551 = vrot.lane.b32.xlu0 %v4565_v24, %s4344_s16 }
  0xfa   :  { %v503_v29 = vpop.f32.mrf.mxu1 }
  0xfb   :  { %v504_v32 = vadd.f32 %v503_v29, %v443_v26 }
  0xfc   :  { %v446_v37 = vpop.f32.mrf.mxu0 }
  0xfd   :  { %v4568_v36 = vadd.f32 %v532_v6, %v504_v32  ;;  %v447_v39 = vadd.f32 %v446_v37, %v370_v38  ;;  %v752_v32 = vsub.f32 %v727_v59, %v751_v25 }
  0xff   :  { %722 = vrot.lane.b32.xlu2 %v4568_v36, %s4344_s16  ;;  %v753_v38 = vand.u32 4294901760, %v752_v32 }
 0x102   :  { %v507_v40 = vpop.f32.mrf.mxu1 }
 0x103   :  { %v508_v41 = vadd.f32 %v507_v40, %v447_v39 }
 0x104   :  { %v450_v57 = vpop.f32.mrf.mxu0 }
 0x105   :  { %v4571_v42 = vadd.f32 %v532_v6, %v508_v41  ;;  %v580_v6 = vsub.f32 %v555_v2, %v4583_v4  ;;  %v754_v41 = vsub.f32 %v752_v32, %v753_v38  ;;  %v4605_v2 = vpop.f32.mrf.mxu3 }
 0x107   :  { %724 = vrot.lane.b32.xlu1 %v4571_v42, %s4344_s16  ;;  %v581_v56 = vand.u32 4294901760, %v580_v6  ;;  %v755_v43 = vand.u32 4294901760, %v754_v41 }
 0x109   :  { %v582_v12 = vsub.f32 %v580_v6, %v581_v56 }
 0x10b   :  { %v583_v53 = vand.u32 4294901760, %v582_v12 }
 0x10f   :  { %540 = vrot.lane.b32.xlu1 %v538_v58, %s4345_s17 }
 0x159   :  { %v723_v31 = vpop.permute.xlu2 %722 }
 0x15a   :  { %v729_v20 = vsel %vm553_vm1, %v723_v31, 0 }
 0x15b   :  { %v749_v61 = vand.u32 4294901760, %v729_v20 }
 0x15d   :  { %v781_v28 = vsub.f32 %v729_v20, %v749_v61 }
 0x15f   :  { %v782_v33 = vand.u32 4294901760, %v781_v28 }
 0x161   :  { %v550_v3 = vpop.permute.xlu1 %549  ;;  %v783_v40 = vsub.f32 %v781_v28, %v782_v33 }
 0x162   :  { %v557_v5 = vsel %vm553_vm1, %v550_v3, 0  ;;  %v312_v3 = vpop.f32.mrf.mxu2 }
 0x163   :  { %v577_v23 = vand.u32 4294901760, %v557_v5  ;;  %v784_v58 = vand.u32 4294901760, %v783_v40 }
 0x165   :  { %v609_v7 = vsub.f32 %v557_v5, %v577_v23 }
 0x167   :  { %v610_v16 = vand.u32 4294901760, %v609_v7 }
 0x169   :  { %v552_v35 = vpop.permute.xlu0 %551  ;;  %v611_v55 = vsub.f32 %v609_v7, %v610_v16 }
 0x16a   :  { %v559_v51 = vsel %vm553_vm1, %v552_v35, 0 }
 0x16b   :  { %v575_v8 = vand.u32 4294901760, %v559_v51  ;;  %v612_v21 = vand.u32 4294901760, %v611_v55 }
 0x16d   :  { %v603_v10 = vsub.f32 %v559_v51, %v575_v8  ;;  %576 = vmatpush.xpose.msra.mxu2 %v575_v8 }
 0x16f   :  { %v604_v27 = vand.u32 4294901760, %v603_v10 }
 0x171   :  { %v605_v17 = vsub.f32 %v603_v10, %v604_v27  ;;  %578 = vmatpush.xpose.msra.mxu2 %v577_v23 }
 0x173   :  { %v606_v19 = vand.u32 4294901760, %v605_v17 }
 0x174   :  { %584 = vmatmul.f32.vlgmr.msra.gmra.mxu2 %v583_v53 }
 0x175   :  { %635 = vmatpush.xpose.msrb.mxu2 %v603_v10  ;;  %607 = vmatpush.xpose.msra.mxu3 %v606_v19  ;;  %v230_v19 = vadd.f32 %v4548_v52, %v4546_v49 }
 0x179   :  { %638 = vmatpush.xpose.msrb.mxu2 %v609_v7  ;;  %613 = vmatpush.xpose.msra.mxu3 %v612_v21  ;;  %v725_v22 = vpop.permute.xlu1 %724  ;;  %v511_v7 = vpop.f32.mrf.mxu1 }
 0x17a   :  { %v731_v26 = vsel %vm553_vm1, %v725_v22, 0 }
 0x17b   :  { %v747_v29 = vand.u32 4294901760, %v731_v26 }
 0x17c   :  { %615 = vmatmul.f32.vlgmr.msra.gmra.mxu3 %v4583_v4  ;;  %641 = vmatmul.f32.vlgmr.msrb.gmra.mxu2 %v580_v6 }
 0x17d   :  { %687 = vmatpush.xpose.msra.mxu2 %v604_v27  ;;  %660 = vmatpush.xpose.msrb.mxu3 %v575_v8  ;;  %v775_v30 = vsub.f32 %v731_v26, %v747_v29 }
 0x17f   :  { %v776_v34 = vand.u32 4294901760, %v775_v30 }
 0x181   :  { %691 = vmatpush.xpose.msra.mxu2 %v610_v16  ;;  %662 = vmatpush.xpose.msrb.mxu3 %v577_v23  ;;  %v777_v37 = vsub.f32 %v775_v30, %v776_v34  ;;  %v454_v16 = vpop.f32.mrf.mxu0  ;;  %v515_v31 = vpop.f32.mrf.mxu1 }
 0x183   :  { %v778_v39 = vand.u32 4294901760, %v777_v37 }
 0x184   :  { %666 = vmatmul.f32.vlgmr.msrb.gmra.mxu3 %v581_v56  ;;  %693 = vmatmul.f32.vlgmr.msra.gmra.mxu2 %v4583_v4 }
 0x185   :  { %748 = vmatpush.xpose.msrb.mxu2 %v747_v29  ;;  %712 = vmatpush.xpose.msra.mxu3 %v575_v8 }
 0x189   :  { %750 = vmatpush.xpose.msrb.mxu2 %v749_v61  ;;  %714 = vmatpush.xpose.msra.mxu3 %v577_v23  ;;  %v4610_v20 = vpop.f32.mrf.mxu0  ;;  %v4612_v21 = vpop.f32.mrf.mxu1 }
 0x18c   :  { %716 = vmatmul.f32.vlgmr.msra.gmra.mxu3 %v4583_v4  ;;  %756 = vmatmul.f32.vlgmr.msrb.gmra.mxu2 %v755_v43  ;;  %v393_v4 = vpop.f32.mrf.mxu3 }
 0x18d   :  { %807 = vmatpush.xpose.msra.mxu2 %v775_v30  ;;  %779 = vmatpush.xpose.msrb.mxu3 %v778_v39 }
 0x191   :  { %810 = vmatpush.xpose.msra.mxu2 %v781_v28  ;;  %785 = vmatpush.xpose.msrb.mxu3 %v784_v58  ;;  %v523_v41 = vpop.f32.mrf.mxu1 }
 0x194   :  { %787 = vmatmul.f32.vlgmr.msrb.gmra.mxu3 %v751_v25  ;;  %813 = vmatmul.f32.vlgmr.msra.gmra.mxu2 %v752_v32  ;;  %v238_v32 = vadd.f32 %v4542_v47, %v4540_v46  ;;  %v226_v47 = vadd.f32 %v4544_v48, %v4538_v45 }
 0x195   :  { %832 = vmatpush.xpose.msra.mxu3 %v747_v29  ;;  %859 = vmatpush.xpose.msrb.mxu2 %v776_v34 }
 0x196   :  { %v313_v52 = vadd.f32 %v312_v3, %v238_v32 }
 0x198   :  { %v394_v40 = vadd.f32 %v393_v4, %v313_v52 }
 0x199   :  { %834 = vmatpush.xpose.msra.mxu3 %v749_v61  ;;  %863 = vmatpush.xpose.msrb.mxu2 %v782_v33 }
 0x19c   :  { %838 = vmatmul.f32.vlgmr.msra.gmra.mxu3 %v753_v38  ;;  %865 = vmatmul.f32.vlgmr.msrb.gmra.mxu2 %v751_v25  ;;  %v462_v38 = vpop.f32.mrf.mxu0 }
 0x19d   :  { %884 = vmatpush.xpose.msrb.mxu3 %v747_v29  ;;  %v4614_v29 = vpop.permute.xlu1 %540  ;;  %v463_v58 = vadd.f32 %v462_v38, %v394_v40 }
 0x19f   :  { %v524_v43 = vadd.f32 %v523_v41, %v463_v58 }
 0x1a1   :  { %886 = vmatpush.xpose.msrb.mxu3 %v749_v61  ;;  %v303_v61 = vadd.f32 %v302_v62, %v230_v19  ;;  %v4625_v46 = vadd.f32 %v4614_v29, %v524_v43  ;;  %v298_v62 = vadd.f32 %v297_v44, %v226_v47  ;;  %v234_v19 = vadd.f32 %v4554_v54, %v4550_v15 }
 0x1a4   :  { %888 = vmatmul.f32.vlgmr.msrb.gmra.mxu3 %v751_v25  ;;  %v382_v25 = vadd.f32 %v381_v63, %v303_v61  ;;  %v376_v63 = vadd.f32 %v375_v60, %v298_v62 }
 0x1a6   :  { %v455_v26 = vadd.f32 %v454_v16, %v382_v25  ;;  %v451_v3 = vadd.f32 %v450_v57, %v376_v63 }
 0x1a8   :  { %v516_v33 = vadd.f32 %v515_v31, %v455_v26  ;;  %v512_v4 = vadd.f32 %v511_v7, %v451_v3 }
 0x1aa   :  { %v4619_v37 = vadd.f32 %v4614_v29, %v516_v33 }
 0x1f7   :  { %v585_v5 = vpop.f32.mrf.mxu2 }
 0x1ff   :  { %v616_v6 = vpop.f32.mrf.mxu3  ;;  %v642_v14 = vpop.f32.mrf.mxu2 }
 0x200   :  { %v617_v23 = vadd.f32 %v616_v6, %v585_v5  ;;  %v4633_v5 = vadd.f32 %v4614_v29, %v512_v4 }
 0x202   :  { %v643_v51 = vadd.f32 %v642_v14, %v617_v23 }
 0x207   :  { %v667_v50 = vpop.f32.mrf.mxu3  ;;  %v694_v35 = vpop.f32.mrf.mxu2 }
 0x208   :  { %v668_v56 = vadd.f32 %v667_v50, %v643_v51 }
 0x20a   :  { %v695_v8 = vadd.f32 %v694_v35, %v668_v56 }
 0x20f   :  { %v717_v9 = vpop.f32.mrf.mxu3  ;;  %v757_v12 = vpop.f32.mrf.mxu2 }
 0x210   :  { %v718_v10 = vadd.f32 %v717_v9, %v695_v8 }
 0x212   :  { %v893_v13 = vsel %vm892_vm2, %v718_v10, -inf }
 0x213   :  { %894 = vmax.xlane.f32.xlu2 %v893_v13 }
 0x217   :  { %v788_v27 = vpop.f32.mrf.mxu3  ;;  %v814_v17 = vpop.f32.mrf.mxu2 }
 0x218   :  { %v789_v53 = vadd.f32 %v788_v27, %v757_v12 }
 0x21a   :  { %v815_v59 = vadd.f32 %v814_v17, %v789_v53 }
 0x21f   :  { %v839_v55 = vpop.f32.mrf.mxu3  ;;  %v866_v28 = vpop.f32.mrf.mxu2 }
 0x220   :  { %v840_v22 = vadd.f32 %v839_v55, %v815_v59  ;;  %v308_v59 = vadd.f32 %v4603_v0, %v234_v19 }
 0x222   :  { %v867_v30 = vadd.f32 %v866_v28, %v840_v22  ;;  %v388_v22 = vadd.f32 %v4605_v2, %v308_v59 }
 0x224   :  { %v459_v25 = vadd.f32 %v4610_v20, %v388_v22 }
 0x226   :  { %v520_v26 = vadd.f32 %v4612_v21, %v459_v25 }
 0x227   :  { %v889_v34 = vpop.f32.mrf.mxu3 }
 0x228   :  { %v890_v49 = vadd.f32 %v889_v34, %v867_v30  ;;  %v4668_v28 = vadd.f32 %v4614_v29, %v520_v26 }
 0x22a   :  { %v896_v39 = vsel %vm892_vm2, %v890_v49, -inf }
 0x22b   :  { %897 = vmax.xlane.f32.xlu0 %v896_v39  ;;  %945 = vrot.lane.b32.xlu2 %v4619_v37, %s4345_s17 }
 0x233   :  { %1115 = vrot.lane.b32.xlu2 %v4625_v46, %s4345_s17 }
 0x23b   :  { %1283 = vrot.lane.b32.xlu2 %v4562_v11, %s4346_s18 }
 0x23f   :  { %943 = vrot.lane.b32.xlu0 %v4633_v5, %s4345_s17 }
 0x243   :  { %1456 = vrot.lane.b32.xlu2 %v4571_v42, %s4346_s18 }
 0x247   :  { %1285 = vrot.lane.b32.xlu0 %v4565_v24, %s4346_s18 }
 0x24b   :  { %1452 = vrot.lane.b32.xlu2 %v4594_v18, %s4347_s19 }
 0x24f   :  { %1281 = vrot.lane.b32.xlu0 %v4579_v1, %s4347_s19 }
 0x257   :  { %1454 = vrot.lane.b32.xlu0 %v4568_v36, %s4346_s18 }
 0x286   :  { %v895_v45 = vpop.xlane.xlu2 %894 }
 0x287   :  { %v899_v48 = vsub.f32 %v718_v10, %v895_v45 }
 0x289   :  { %v901_v44 = vmul.f32 1.442695, %v899_v48 }
 0x28b   :  { %4300 = vpow2.f32 %v901_v44 }
 0x28e   :  { %v946_v60 = vpop.permute.xlu2 %945 }
 0x28f   :  { %v966_v6 = vand.u32 4294901760, %v946_v60 }
 0x291   :  { %v4301_v14 = vpop.eup %4300  ;;  %v4642_v23 = vsub.f32 %v946_v60, %v966_v6  ;;  %967 = vmatpush.msra.mxu2 %v966_v6 }
 0x292   :  { %v905_v50 = vsel %vm892_vm2, %v4301_v14, 0.0 }
 0x293   :  { %v995_v35 = vand.u32 4294901760, %v4642_v23  ;;  %906 = vadd.xlane.f32.xlu1 %v905_v50 }
 0x295   :  { %v996_v51 = vsub.f32 %v4642_v23, %v995_v35 }
 0x296   :  { %v1116_v56 = vpop.permute.xlu2 %1115 }
 0x297   :  { %v997_v57 = vand.u32 4294901760, %v996_v51  ;;  %v4649_v7 = vand.u32 4294901760, %v1116_v56 }
 0x299   :  { %v4652_v8 = vsub.f32 %v1116_v56, %v4649_v7  ;;  %998 = vmatpush.msra.mxu3 %v997_v57  ;;  %1221 = vmatpush.msra.mxu1 %v4649_v7 }
 0x29b   :  { %1196 = vmatpush.msra.mxu0 %v4652_v8  ;;  %v1165_v39 = vand.u32 4294901760, %v4652_v8 }
 0x29d   :  { %v1166_v58 = vsub.f32 %v4652_v8, %v1165_v39 }
 0x29e   :  { %v898_v9 = vpop.xlane.xlu0 %897  ;;  %v1284_v44 = vpop.permute.xlu2 %1283 }
 0x29f   :  { %v900_v10 = vsub.f32 %v890_v49, %v898_v9  ;;  %v1167_v63 = vand.u32 4294901760, %v1166_v58  ;;  %v1289_v50 = vsel %vm553_vm1, %v1284_v44, 0 }
 0x2a0   :  { %v4683_v9 = vand.u32 4294901760, %v1289_v50 }
 0x2a1   :  { %v903_v12 = vmul.f32 1.442695, %v900_v10 }
 0x2a3   :  { %4302 = vpow2.f32 %v903_v12 }
 0x2a9   :  { %v4656_v13 = vpop.eup %4302 }
 0x2aa   :  { %v908_v16 = vsel %vm892_vm2, %v4656_v13, 0.0 }
 0x2ab   :  { %909 = vadd.xlane.f32.xlu1 %v908_v16 }
 0x2b1   :  { %v944_v27 = vpop.permute.xlu0 %943 }
 0x2b2   :  { %v968_v31 = vand.u32 4294901760, %v944_v27 }
 0x2b4   :  { %v1000_v17 = vsub.f32 %v944_v27, %v968_v31  ;;  %969 = vmatpush.msra.mxu2 %v968_v31 }
 0x2b6   :  { %1026 = vmatpush.msrb.mxu2 %v4642_v23  ;;  %v1001_v53 = vand.u32 4294901760, %v1000_v17 }
 0x2b8   :  { %1029 = vmatpush.msrb.mxu2 %v1000_v17  ;;  %v1002_v55 = vsub.f32 %v1000_v17, %v1001_v53  ;;  %v4690_v17 = vsub.f32 %v1289_v50, %v4683_v9 }
 0x2b9   :  { %v1286_v62 = vpop.permute.xlu0 %1285 }
 0x2ba   :  { %v1003_v61 = vand.u32 4294901760, %v1002_v55  ;;  %v1291_v45 = vsel %vm553_vm1, %v1286_v62, 0  ;;  %v1342_v22 = vand.u32 4294901760, %v4690_v17 }
 0x2bc   :  { %1004 = vmatpush.msra.mxu3 %v1003_v61  ;;  %v1457_v61 = vpop.permute.xlu2 %1456 }
 0x2be   :  { %1051 = vmatpush.msrb.mxu3 %v966_v6 }
 0x2c0   :  { %1053 = vmatpush.msrb.mxu3 %v968_v31 }
 0x2c1   :  { %v1282_v12 = vpop.permute.xlu0 %1281 }
 0x2c2   :  { %v1287_v27 = vsel %vm553_vm1, %v1282_v12, 0 }
 0x2c3   :  { %v4693_v55 = vand.u32 4294901760, %v1287_v27 }
 0x2c4   :  { %1113 = vrot.lane.b32.xlu1 %v4668_v28, %s4345_s17 }
 0x306   :  { %v907_v15 = vpop.xlane.xlu1 %906 }
 0x307   :  { %4304 = vrcp.f32 %v907_v15  ;;  %v922_v32 = vand.u32 2147483648, %v907_v15  ;;  %v920_v33 = vand.u32 2147483647, %v907_v15  ;;  %vm916_vm4 = vweird.f32 %v907_v15 }
 0x309   :  { %v923_v20 = vor.u32 1.1754944e-38, %v922_v32  ;;  %vm921_vm6 = vcmp.eq.f32.partialorder %v920_v33, 8.507059e+37  ;;  %v1455_v32 = vpop.permute.xlu0 %1454 }
 0x30d   :  { %v4305_v54 = vpop.eup %4304 }
 0x30e   :  { %v912_v0 = vmul.f32 %v4305_v54, %v907_v15  ;;  %vm917_vm3 = vweird.f32 %v4305_v54 }
 0x30f   :  { %vm918_vm5 = vmor %vm916_vm4, %vm917_vm3 }
 0x310   :  { %v913_v30 = vsub.f32 1.0, %v912_v0 }
 0x312   :  { %v914_v2 = vmul.f32 %v4305_v54, %v913_v30 }
 0x314   :  { %v915_v34 = vadd.f32 %v4305_v54, %v914_v2 }
 0x316   :  { %v919_v21 = vsel %vm918_vm5, %v4305_v54, %v915_v34  ;;  %v4701_v54 = vsub.f32 %v1287_v27, %v4693_v55 }
 0x317   :  { %v924_v29 = vsel %vm921_vm6, %v923_v20, %v919_v21  ;;  %v1343_v20 = vsub.f32 %v4690_v17, %v1342_v22 }
 0x318   :  { %v925_v49 = vmul.f32 %v4301_v14, %v924_v29  ;;  %v1313_v29 = vand.u32 4294901760, %v4701_v54 }
 0x31a   :  { %v950_v52 = vsel %vm892_vm2, %v925_v49, 0  ;;  %v1460_v49 = vsel %vm553_vm1, %v1455_v32, 0  ;;  %v1314_v8 = vsub.f32 %v4701_v54, %v1313_v29 }
 0x31b   :  { %v970_v38 = vand.u32 4294901760, %v950_v52 }
 0x31d   :  { %v971_v40 = vsub.f32 %v950_v52, %v970_v38  ;;  %1006 = vmatmul.f32.vlgmr.msra.gmra.mxu3 %v970_v38 }
 0x31e   :  { %1103 = vmatpush.msra.mxu3 %v966_v6  ;;  %v910_v41 = vpop.xlane.xlu1 %909  ;;  %v4680_v6 = vand.u32 4294901760, %v1291_v45 }
 0x31f   :  { %4306 = vrcp.f32 %v910_v41  ;;  %v972_v43 = vand.u32 4294901760, %v971_v40  ;;  %v937_v14 = vand.u32 2147483648, %v910_v41  ;;  %v935_v56 = vand.u32 2147483647, %v910_v41 }
 0x320   :  { %1105 = vmatpush.msra.mxu3 %v968_v31  ;;  %vm931_vm8 = vweird.f32 %v910_v41  ;;  %v1335_v10 = vsub.f32 %v1291_v45, %v4680_v6 }
 0x321   :  { %v973_v47 = vsub.f32 %v971_v40, %v972_v43  ;;  %v938_v23 = vor.u32 1.1754944e-38, %v937_v14  ;;  %vm936_vm10 = vcmp.eq.f32.partialorder %v935_v56, 8.507059e+37 }
 0x323   :  { %v974_v3 = vand.u32 4294901760, %v973_v47  ;;  %v1480_v47 = vand.u32 4294901760, %v1460_v49 }
 0x325   :  { %v4307_v4 = vpop.eup %4306  ;;  %1057 = vmatmul.f32.vlgmr.msrb.gmra.mxu3 %v972_v43  ;;  %975 = vmatmul.f32.vlgmr.msra.gmra.mxu2 %v974_v3  ;;  %v1453_v43 = vpop.permute.xlu2 %1452  ;;  %v1512_v3 = vsub.f32 %v1460_v49, %v1480_v47 }
 0x326   :  { %v927_v48 = vmul.f32 %v4307_v4, %v910_v41  ;;  %1168 = vmatpush.msrb.mxu3 %v1167_v63  ;;  %1078 = vmatpush.msra.mxu2 %v995_v35  ;;  %vm932_vm7 = vweird.f32 %v4307_v4  ;;  %v1458_v62 = vsel %vm553_vm1, %v1453_v43, 0  ;;  %v4338_v43 = vld [vmem:[%s4994_s1] sm:$0xff] }
 0x327   :  { %vm933_vm9 = vmor %vm931_vm8, %vm932_vm7  ;;  %v1482_v45 = vand.u32 4294901760, %v1458_v62  ;;  %v1513_v44 = vand.u32 4294901760, %v1512_v3 }
 0x328   :  { %v928_v60 = vsub.f32 1.0, %v927_v48  ;;  %1082 = vmatpush.msra.mxu2 %v1001_v53  ;;  %v1336_v53 = vand.u32 4294901760, %v1335_v10 }
 0x329   :  { %v1514_v14 = vsub.f32 %v1512_v3, %v1513_v44 }
 0x32a   :  { %v929_v51 = vmul.f32 %v4307_v4, %v928_v60  ;;  %v1337_v25 = vsub.f32 %v1335_v10, %v1336_v53  ;;  %v1483_v60 = vsub.f32 %v1458_v62, %v1482_v45 }
 0x32c   :  { %v930_v57 = vadd.f32 %v4307_v4, %v929_v51  ;;  %v1338_v2 = vand.u32 4294901760, %v1337_v25  ;;  %v1484_v50 = vand.u32 4294901760, %v1483_v60 }
 0x32d   :  { %1107 = vmatmul.f32.vlgmr.msra.gmra.mxu3 %v970_v38  ;;  %1032 = vmatmul.f32.vlgmr.msrb.gmra.mxu2 %v971_v40  ;;  %v1344_v40 = vand.u32 4294901760, %v1343_v20 }
 0x32e   :  { %v934_v35 = vsel %vm933_vm9, %v4307_v4, %v930_v57  ;;  %1137 = vmatpush.msrb.mxu2 %v4649_v7  ;;  %v1315_v4 = vand.u32 4294901760, %v1314_v8  ;;  %v1485_v51 = vsub.f32 %v1483_v60, %v1484_v50 }
 0x32f   :  { %v939_v16 = vsel %vm936_vm10, %v938_v23, %v934_v35 }
 0x330   :  { %v940_v31 = vmul.f32 %v4656_v13, %v939_v16  ;;  %v1462_v13 = vsel %vm553_vm1, %v1457_v61, 0  ;;  %v1486_v56 = vand.u32 4294901760, %v1485_v51 }
 0x331   :  { %v4704_v21 = vand.u32 4294901760, %v1462_v13 }
 0x332   :  { %v1120_v19 = vsel %vm892_vm2, %v940_v31, 0 }
 0x333   :  { %v4695_v59 = vand.u32 4294901760, %v1120_v19  ;;  %v1506_v58 = vsub.f32 %v1462_v13, %v4704_v21 }
 0x335   :  { %v1141_v26 = vsub.f32 %v1120_v19, %v4695_v59  ;;  %1084 = vmatmul.f32.vlgmr.msra.gmra.mxu2 %v970_v38  ;;  %v1507_v63 = vand.u32 4294901760, %v1506_v58 }
 0x336   :  { %v1114_v15 = vpop.permute.xlu1 %1113 }
 0x337   :  { %v1138_v0 = vand.u32 4294901760, %v1114_v15  ;;  %v1142_v30 = vand.u32 4294901760, %v1141_v26  ;;  %v1508_v48 = vsub.f32 %v1506_v58, %v1507_v63 }
 0x339   :  { %v1170_v33 = vsub.f32 %v1114_v15, %v1138_v0  ;;  %1139 = vmatpush.msrb.mxu2 %v1138_v0  ;;  %1223 = vmatpush.msra.mxu1 %v1138_v0  ;;  %v1143_v34 = vsub.f32 %v1141_v26, %v1142_v30 }
 0x33a   :  { %1227 = vmatmul.f32.vlgmr.msra.gmra.mxu1 %v1142_v30 }
 0x33b   :  { %1248 = vmatpush.msra.mxu2 %v1165_v39  ;;  %1339 = vmatpush.xpose.msrb.mxu1 %v1338_v2  ;;  %v1144_v52 = vand.u32 4294901760, %v1143_v34  ;;  %v1171_v38 = vand.u32 4294901760, %v1170_v33 }
 0x33c   :  { %1199 = vmatpush.msra.mxu0 %v1170_v33 }
 0x33d   :  { %1202 = vmatmul.f32.vlgmr.msra.gmra.mxu0 %v1141_v26  ;;  %1252 = vmatpush.msra.mxu2 %v1171_v38  ;;  %v1172_v41 = vsub.f32 %v1170_v33, %v1171_v38 }
 0x33e   :  { %1308 = vmatpush.xpose.msrb.mxu0 %v4680_v6  ;;  %1145 = vmatmul.f32.vlgmr.msrb.gmra.mxu2 %v1144_v52 }
 0x33f   :  { %1345 = vmatpush.xpose.msrb.mxu1 %v1344_v40  ;;  %1367 = vmatpush.xpose.msrb.mxu2 %v1335_v10  ;;  %v1173_v39 = vand.u32 4294901760, %v1172_v41 }
 0x341   :  { %1174 = vmatpush.msrb.mxu3 %v1173_v39 }
 0x342   :  { %1310 = vmatpush.xpose.msrb.mxu0 %v4683_v9  ;;  %1176 = vmatmul.f32.vlgmr.msrb.gmra.mxu3 %v4695_v59 }
 0x343   :  { %1444 = vmatpush.xpose.msra.mxu1 %v4680_v6  ;;  %1273 = vmatpush.msra.mxu3 %v4649_v7  ;;  %v1509_v7 = vand.u32 4294901760, %v1508_v48 }
 0x344   :  { %1347 = vmatmul.f32.vlgmr.msrb.gmra.mxu1 %v4693_v55  ;;  %1370 = vmatpush.xpose.msrb.mxu2 %v4690_v17 }
 0x345   :  { %1275 = vmatpush.msra.mxu3 %v1138_v0  ;;  %1316 = vmatmul.f32.vlgmr.msrb.gmra.mxu0 %v1315_v4 }
 0x346   :  { %1419 = vmatpush.xpose.msra.mxu0 %v1336_v53  ;;  %1254 = vmatmul.f32.vlgmr.msra.gmra.mxu2 %v4695_v59 }
 0x347   :  { %1446 = vmatpush.xpose.msra.mxu1 %v4683_v9  ;;  %1392 = vmatpush.xpose.msrb.mxu3 %v4680_v6  ;;  %v1515_v6 = vand.u32 4294901760, %v1514_v14 }
 0x348   :  { %1479 = vmatpush.xpose.msra.mxu2 %v4704_v21 }
 0x34a   :  { %1423 = vmatpush.xpose.msra.mxu0 %v1342_v22  ;;  %1277 = vmatmul.f32.vlgmr.msra.gmra.mxu3 %v4695_v59 }
 0x34b   :  { %1563 = vmatpush.xpose.msrb.mxu1 %v4704_v21  ;;  %1394 = vmatpush.xpose.msrb.mxu3 %v4683_v9 }
 0x34c   :  { %1448 = vmatmul.f32.vlgmr.msra.gmra.mxu1 %v4693_v55  ;;  %1481 = vmatpush.xpose.msra.mxu2 %v1480_v47 }
 0x34d   :  { %1425 = vmatmul.f32.vlgmr.msra.gmra.mxu0 %v4693_v55 }
 0x34e   :  { %1538 = vmatpush.xpose.msrb.mxu0 %v1506_v58  ;;  %1373 = vmatmul.f32.vlgmr.msrb.gmra.mxu2 %v4701_v54 }
 0x34f   :  { %1565 = vmatpush.xpose.msrb.mxu1 %v1480_v47  ;;  %1510 = vmatpush.xpose.msra.mxu3 %v1509_v7 }
 0x350   :  { %1590 = vmatpush.xpose.msrb.mxu2 %v1507_v63 }
 0x352   :  { %1541 = vmatpush.xpose.msrb.mxu0 %v1512_v3  ;;  %1398 = vmatmul.f32.vlgmr.msrb.gmra.mxu3 %v1313_v29 }
 0x353   :  { %1516 = vmatpush.xpose.msra.mxu3 %v1515_v6 }
 0x354   :  { %1594 = vmatpush.xpose.msrb.mxu2 %v1513_v44  ;;  %1569 = vmatmul.f32.vlgmr.msrb.gmra.mxu1 %v1484_v50 }
 0x355   :  { %1544 = vmatmul.f32.vlgmr.msrb.gmra.mxu0 %v1483_v60 }
 0x356   :  { %1487 = vmatmul.f32.vlgmr.msra.gmra.mxu2 %v1486_v56  ;;  %v4339_v56 = vld [vmem:[%s4994_s1 + $0x8] sm:$0xff] }
 0x357   :  { %1615 = vmatpush.xpose.msrb.mxu3 %v4704_v21 }
 0x35a   :  { %1518 = vmatmul.f32.vlgmr.msra.gmra.mxu3 %v1482_v45 }
 0x35b   :  { %1617 = vmatpush.xpose.msrb.mxu3 %v1480_v47 }
 0x35e   :  { %1596 = vmatmul.f32.vlgmr.msrb.gmra.mxu2 %v1482_v45 }
 0x362   :  { %1619 = vmatmul.f32.vlgmr.msrb.gmra.mxu3 %v1482_v45 }
 0x3a0   :  { %v4731_v57 = vpop.f32.mrf.mxu3 }
 0x3a8   :  { %v4733_v9 = vpop.f32.mrf.mxu2  ;;  %v4737_v12 = vpop.f32.mrf.mxu3 }
 0x3b0   :  { %v4735_v10 = vpop.f32.mrf.mxu2  ;;  %v4741_v35 = vpop.f32.mrf.mxu3 }
 0x3b7   :  { %v4747_v31 = vpop.f32.mrf.mxu1 }
 0x3b8   :  { %v4739_v23 = vpop.f32.mrf.mxu2 }
 0x3ba   :  { %v4743_v16 = vpop.f32.mrf.mxu0 }
 0x3c1   :  { %v4745_v27 = vpop.f32.mrf.mxu2  ;;  %v1348_v55 = vpop.f32.mrf.mxu1 }
 0x3c2   :  { %v1317_v19 = vpop.f32.mrf.mxu0 }
 0x3c3   :  { %v1349_v22 = vadd.f32 %v1348_v55, %v1317_v19 }
 0x3c5   :  { %v4749_v17 = vpop.f32.mrf.mxu3 }
 0x3c9   :  { %v4751_v53 = vpop.f32.mrf.mxu2  ;;  %v1449_v54 = vpop.f32.mrf.mxu1 }
 0x3ca   :  { %v1426_v26 = vpop.f32.mrf.mxu0 }
 0x3cd   :  { %v4753_v59 = vpop.f32.mrf.mxu3 }
 0x3d1   :  { %v1374_v61 = vpop.f32.mrf.mxu2  ;;  %v1570_v29 = vpop.f32.mrf.mxu1 }
 0x3d2   :  { %v1375_v25 = vadd.f32 %v1374_v61, %v1349_v22  ;;  %v1545_v20 = vpop.f32.mrf.mxu0 }
 0x3d5   :  { %v1399_v15 = vpop.f32.mrf.mxu3 }
 0x3d6   :  { %v1400_v13 = vadd.f32 %v1399_v15, %v1375_v25 }
 0x3d8   :  { %v1427_v0 = vadd.f32 %v1426_v26, %v1400_v13 }
 0x3d9   :  { %v1488_v30 = vpop.f32.mrf.mxu2 }
 0x3da   :  { %v1450_v32 = vadd.f32 %v1449_v54, %v1427_v0 }
 0x3dc   :  { %v1623_v2 = vsel %vm892_vm2, %v1450_v32, -inf }
 0x3dd   :  { %v1519_v33 = vpop.f32.mrf.mxu3  ;;  %1624 = vmax.xlane.f32.xlu1 %v1623_v2 }
 0x3de   :  { %v1520_v34 = vadd.f32 %v1519_v33, %v1488_v30 }
 0x3e0   :  { %v1546_v21 = vadd.f32 %v1545_v20, %v1520_v34 }
 0x3e1   :  { %v1597_v52 = vpop.f32.mrf.mxu2 }
 0x3e2   :  { %v1571_v49 = vadd.f32 %v1570_v29, %v1546_v21 }
 0x3e4   :  { %v1598_v38 = vadd.f32 %v1597_v52, %v1571_v49 }
 0x3e5   :  { %v1620_v40 = vpop.f32.mrf.mxu3 }
 0x3e6   :  { %v1621_v41 = vadd.f32 %v1620_v40, %v1598_v38 }
 0x3e8   :  { %v1626_v58 = vsel %vm892_vm2, %v1621_v41, -inf }
 0x3e9   :  { %1627 = vmax.xlane.f32.xlu0 %v1626_v58 }
 0x3fd   :  { %1673 = vrot.lane.b32.xlu0 %v4619_v37, %s4348_s20 }
 0x405   :  { %1839 = vrot.lane.b32.xlu0 %v4668_v28, %s4348_s20 }
 0x40d   :  { %2195 = vrot.lane.b32.xlu0 %v4338_v43, %s4343_s15 }
 0x415   :  { %2381 = vrot.lane.b32.xlu0 %v4579_v1, %s4349_s23 }
 0x41d   :  { %2552 = vrot.lane.b32.xlu0 %v4594_v18, %s4349_s23 }
 0x425   :  { %2771 = vrot.lane.b32.xlu0 %v4633_v5, %s4350_s24 }
 0x450   :  { %v1625_v47 = vpop.xlane.xlu1 %1624 }
 0x451   :  { %v1629_v8 = vsub.f32 %v1450_v32, %v1625_v47 }
 0x453   :  { %v1631_v39 = vmul.f32 1.442695, %v1629_v8 }
 0x455   :  { %4308 = vpow2.f32 %v1631_v39 }
 0x45b   :  { %v4309_v62 = vpop.eup %4308 }
 0x45c   :  { %v1628_v63 = vpop.xlane.xlu0 %1627  ;;  %v1635_v3 = vsel %vm892_vm2, %v4309_v62, 0.0 }
 0x45d   :  { %v1630_v4 = vsub.f32 %v1621_v41, %v1628_v63  ;;  %1636 = vadd.xlane.f32.xlu2 %v1635_v3 }
 0x45f   :  { %v1633_v45 = vmul.f32 1.442695, %v1630_v4 }
 0x461   :  { %4310 = vpow2.f32 %v1633_v45 }
 0x467   :  { %v4770_v48 = vpop.eup %4310 }
 0x468   :  { %v1638_v44 = vsel %vm892_vm2, %v4770_v48, 0.0 }
 0x469   :  { %1639 = vadd.xlane.f32.xlu1 %v1638_v44 }
 0x46f   :  { %v1674_v60 = vpop.permute.xlu0 %1673 }
 0x470   :  { %v1694_v7 = vand.u32 4294901760, %v1674_v60 }
 0x472   :  { %v1722_v14 = vsub.f32 %v1674_v60, %v1694_v7  ;;  %1695 = vmatpush.msra.mxu0 %v1694_v7  ;;  %1779 = vmatpush.msra.mxu3 %v1694_v7 }
 0x474   :  { %v1723_v50 = vand.u32 4294901760, %v1722_v14  ;;  %1754 = vmatpush.msra.mxu2 %v1722_v14 }
 0x475   :  { %1671 = vrot.lane.b32.xlu2 %v4633_v5, %s4348_s20 }
 0x476   :  { %v1724_v6 = vsub.f32 %v1722_v14, %v1723_v50 }
 0x477   :  { %v1840_v60 = vpop.permute.xlu0 %1839 }
 0x478   :  { %v1725_v51 = vand.u32 4294901760, %v1724_v6 }
 0x47a   :  { %1726 = vmatpush.msra.mxu1 %v1725_v51 }
 0x47d   :  { %2008 = vrot.lane.b32.xlu2 %v4339_v56, %s4343_s15  ;;  %v1864_v56 = vand.u32 4294901760, %v1840_v60 }
 0x482   :  { %1841 = vrot.lane.b32.xlu1 %v4625_v46, %s4348_s20 }
 0x485   :  { %2383 = vrot.lane.b32.xlu2 %v4562_v11, %s4351_s27 }
 0x48a   :  { %2385 = vrot.lane.b32.xlu1 %v4565_v24, %s4351_s27 }
 0x48d   :  { %2554 = vrot.lane.b32.xlu2 %v4568_v36, %s4351_s27 }
 0x492   :  { %2556 = vrot.lane.b32.xlu1 %v4571_v42, %s4351_s27 }
 0x4d0   :  { %v1637_v19 = vpop.xlane.xlu2 %1636 }
 0x4d1   :  { %4312 = vrcp.f32 %v1637_v19  ;;  %v1652_v15 = vand.u32 2147483648, %v1637_v19  ;;  %v1650_v0 = vand.u32 2147483647, %v1637_v19  ;;  %vm1646_vm12 = vweird.f32 %v1637_v19 }
 0x4d3   :  { %v1653_v33 = vor.u32 1.1754944e-38, %v1652_v15  ;;  %vm1651_vm14 = vcmp.eq.f32.partialorder %v1650_v0, 8.507059e+37  ;;  %v2196_v0 = vpop.permute.xlu0 %2195 }
 0x4d7   :  { %v4313_v55 = vpop.eup %4312 }
 0x4d8   :  { %v1642_v61 = vmul.f32 %v4313_v55, %v1637_v19  ;;  %v1672_v22 = vpop.permute.xlu2 %1671  ;;  %vm1647_vm11 = vweird.f32 %v4313_v55 }
 0x4d9   :  { %v1696_v25 = vand.u32 4294901760, %v1672_v22  ;;  %vm1648_vm13 = vmor %vm1646_vm12, %vm1647_vm11 }
 0x4da   :  { %v1643_v26 = vsub.f32 1.0, %v1642_v61 }
 0x4db   :  { %v1728_v13 = vsub.f32 %v1672_v22, %v1696_v25  ;;  %1697 = vmatpush.msra.mxu0 %v1696_v25  ;;  %1781 = vmatpush.msra.mxu3 %v1696_v25  ;;  %v1896_v22 = vsub.f32 %v1840_v60, %v1864_v56 }
 0x4dc   :  { %v1644_v54 = vmul.f32 %v4313_v55, %v1643_v26  ;;  %v1640_v30 = vpop.xlane.xlu1 %1639 }
 0x4dd   :  { %1806 = vmatpush.msrb.mxu0 %v1723_v50  ;;  %4314 = vrcp.f32 %v1640_v30  ;;  %1757 = vmatpush.msra.mxu2 %v1728_v13  ;;  %v1729_v2 = vand.u32 4294901760, %v1728_v13  ;;  %v1667_v43 = vand.u32 2147483648, %v1640_v30  ;;  %v1665_v39 = vand.u32 2147483647, %v1640_v30 }
 0x4de   :  { %v1645_v32 = vadd.f32 %v4313_v55, %v1644_v54  ;;  %vm1661_vm3 = vweird.f32 %v1640_v30 }
 0x4df   :  { %1810 = vmatpush.msrb.mxu0 %v1729_v2  ;;  %v1730_v20 = vsub.f32 %v1728_v13, %v1729_v2  ;;  %v1668_v45 = vor.u32 1.1754944e-38, %v1667_v43  ;;  %vm1666_vm5 = vcmp.eq.f32.partialorder %v1665_v39, 8.507059e+37  ;;  %v1897_v2 = vand.u32 4294901760, %v1896_v22 }
 0x4e0   :  { %v1649_v34 = vsel %vm1648_vm13, %v4313_v55, %v1645_v32  ;;  %v2009_v63 = vpop.permute.xlu2 %2008 }
 0x4e1   :  { %v1654_v21 = vsel %vm1651_vm14, %v1653_v33, %v1649_v34  ;;  %v1731_v29 = vand.u32 4294901760, %v1730_v20  ;;  %v4787_v3 = vand.u32 4294901760, %v2009_v63 }
 0x4e2   :  { %v1655_v49 = vmul.f32 %v4309_v62, %v1654_v21 }
 0x4e3   :  { %v4315_v52 = vpop.eup %4314  ;;  %1732 = vmatpush.msra.mxu1 %v1731_v29  ;;  %v2067_v50 = vsub.f32 %v2009_v63, %v4787_v3 }
 0x4e4   :  { %v1657_v38 = vmul.f32 %v4315_v52, %v1640_v30  ;;  %v1678_v40 = vsel %vm892_vm2, %v1655_v49, 0  ;;  %vm1662_vm15 = vweird.f32 %v4315_v52  ;;  %v4792_v30 = vand.u32 4294901760, %v2196_v0 }
 0x4e5   :  { %1831 = vmatpush.msrb.mxu1 %v1694_v7  ;;  %v1698_v41 = vand.u32 4294901760, %v1678_v40  ;;  %vm1663_vm4 = vmor %vm1661_vm3, %vm1662_vm15  ;;  %v2068_v61 = vand.u32 4294901760, %v2067_v50  ;;  %v1898_v49 = vsub.f32 %v1896_v22, %v1897_v2 }
 0x4e6   :  { %v1658_v58 = vsub.f32 1.0, %v1657_v38  ;;  %v4795_v21 = vsub.f32 %v2196_v0, %v4792_v30 }
 0x4e7   :  { %1833 = vmatpush.msrb.mxu1 %v1696_v25  ;;  %v1699_v47 = vsub.f32 %v1678_v40, %v1698_v41  ;;  %v2069_v15 = vsub.f32 %v2067_v50, %v2068_v61  ;;  %v1899_v40 = vand.u32 4294901760, %v1898_v49 }
 0x4e8   :  { %v1659_v8 = vmul.f32 %v4315_v52, %v1658_v58  ;;  %1734 = vmatmul.f32.vlgmr.msra.gmra.mxu1 %v1698_v41  ;;  %v2255_v38 = vand.u32 4294901760, %v4795_v21 }
 0x4e9   :  { %1760 = vmatmul.f32.vlgmr.msra.gmra.mxu2 %v1699_v47  ;;  %v1700_v62 = vand.u32 4294901760, %v1699_v47  ;;  %v2070_v33 = vand.u32 4294901760, %v2069_v15 }
 0x4ea   :  { %v1660_v4 = vadd.f32 %v4315_v52, %v1659_v8 }
 0x4eb   :  { %1785 = vmatmul.f32.vlgmr.msra.gmra.mxu3 %v1700_v62  ;;  %v1701_v44 = vsub.f32 %v1699_v47, %v1700_v62 }
 0x4ec   :  { %v1664_v7 = vsel %vm1663_vm4, %v4315_v52, %v1660_v4 }
 0x4ed   :  { %v1669_v14 = vsel %vm1666_vm5, %v1668_v45, %v1664_v7  ;;  %v1702_v6 = vand.u32 4294901760, %v1701_v44 }
 0x4ee   :  { %v1670_v51 = vmul.f32 %v4770_v48, %v1669_v14  ;;  %v1008_v14 = vadd.f32 %v4731_v57, %v4733_v9 }
 0x4ef   :  { %1703 = vmatmul.f32.vlgmr.msra.gmra.mxu0 %v1702_v6 }
 0x4f0   :  { %v1846_v19 = vsel %vm892_vm2, %v1670_v51, 0  ;;  %1835 = vmatmul.f32.vlgmr.msrb.gmra.mxu1 %v1698_v41  ;;  %v1178_v51 = vadd.f32 %v4749_v17, %v4745_v27 }
 0x4f1   :  { %v1866_v55 = vand.u32 4294901760, %v1846_v19 }
 0x4f2   :  { %v1204_v9 = vadd.f32 %v4743_v16, %v1178_v51 }
 0x4f3   :  { %v1867_v25 = vsub.f32 %v1846_v19, %v1866_v55 }
 0x4f4   :  { %v1842_v26 = vpop.permute.xlu1 %1841 }
 0x4f5   :  { %v1862_v13 = vand.u32 4294901760, %v1842_v26  ;;  %v1868_v54 = vand.u32 4294901760, %v1867_v25 }
 0x4f7   :  { %v1890_v32 = vsub.f32 %v1842_v26, %v1862_v13  ;;  %1812 = vmatmul.f32.vlgmr.msrb.gmra.mxu0 %v1698_v41  ;;  %1863 = vmatpush.msrb.mxu2 %v1862_v13  ;;  %v1869_v48 = vsub.f32 %v1867_v25, %v1868_v54  ;;  %v2256_v41 = vsub.f32 %v4795_v21, %v2255_v38 }
 0x4f8   :  { %1947 = vmatpush.msra.mxu1 %v1862_v13 }
 0x4f9   :  { %v1891_v34 = vand.u32 4294901760, %v1890_v32  ;;  %1865 = vmatpush.msrb.mxu2 %v1864_v56  ;;  %1922 = vmatpush.msra.mxu0 %v1890_v32  ;;  %v1870_v20 = vand.u32 4294901760, %v1869_v48  ;;  %v2257_v58 = vand.u32 4294901760, %v2256_v41 }
 0x4fa   :  { %1949 = vmatpush.msra.mxu1 %v1864_v56 }
 0x4fb   :  { %v1892_v29 = vsub.f32 %v1890_v32, %v1891_v34  ;;  %1953 = vmatmul.f32.vlgmr.msra.gmra.mxu1 %v1868_v54  ;;  %1871 = vmatmul.f32.vlgmr.msrb.gmra.mxu2 %v1870_v20  ;;  %v2384_v54 = vpop.permute.xlu2 %2383 }
 0x4fc   :  { %1925 = vmatpush.msra.mxu0 %v1896_v22  ;;  %1974 = vmatpush.msra.mxu2 %v1891_v34  ;;  %v1229_v22 = vadd.f32 %v4747_v31, %v1204_v9  ;;  %v2389_v48 = vsel %vm553_vm1, %v2384_v54, 0 }
 0x4fd   :  { %v1893_v52 = vand.u32 4294901760, %v1892_v29  ;;  %2071 = vmatpush.msrb.mxu1 %v2070_v33 }
 0x4fe   :  { %2033 = vmatpush.msrb.mxu0 %v4787_v3  ;;  %1978 = vmatpush.msra.mxu2 %v1897_v2 }
 0x4ff   :  { %2184 = vmatpush.msra.mxu1 %v4787_v3  ;;  %1894 = vmatpush.msrb.mxu3 %v1893_v52 }
 0x500   :  { %1928 = vmatmul.f32.vlgmr.msra.gmra.mxu0 %v1867_v25  ;;  %2098 = vmatpush.msrb.mxu2 %v2067_v50  ;;  %v2386_v25 = vpop.permute.xlu1 %2385 }
 0x501   :  { %2158 = vmatpush.msra.mxu0 %v2068_v61  ;;  %1900 = vmatpush.msrb.mxu3 %v1899_v40 }
 0x502   :  { %1902 = vmatmul.f32.vlgmr.msrb.gmra.mxu3 %v1866_v55 }
 0x503   :  { %1999 = vmatpush.msra.mxu3 %v1862_v13  ;;  %1980 = vmatmul.f32.vlgmr.msra.gmra.mxu2 %v1866_v55  ;;  %v1256_v13 = vadd.f32 %v4751_v53, %v1229_v22 }
 0x504   :  { %2220 = vmatpush.msra.mxu2 %v4792_v30 }
 0x505   :  { %2001 = vmatpush.msra.mxu3 %v1864_v56  ;;  %v1279_v33 = vadd.f32 %v4753_v59, %v1256_v13 }
 0x507   :  { %2126 = vmatpush.msrb.mxu3 %v4787_v3  ;;  %v1034_v3 = vadd.f32 %v4735_v10, %v1008_v14  ;;  %v2202_v52 = vsel %vm553_vm1, %v1279_v33, 0 }
 0x509   :  { %v1059_v19 = vadd.f32 %v4737_v12, %v1034_v3 }
 0x50a   :  { %2003 = vmatmul.f32.vlgmr.msra.gmra.mxu3 %v1866_v55 }
 0x50b   :  { %2258 = vmatpush.msra.mxu3 %v2257_v58  ;;  %v1086_v57 = vadd.f32 %v4739_v23, %v1059_v19  ;;  %v2391_v23 = vsel %vm553_vm1, %v2386_v25, 0 }
 0x50c   :  { %v4824_v32 = vand.u32 4294901760, %v2391_v23 }
 0x50d   :  { %v1109_v17 = vadd.f32 %v4741_v35, %v1086_v57 }
 0x50e   :  { %v4833_v29 = vsub.f32 %v2391_v23, %v4824_v32 }
 0x50f   :  { %v2199_v16 = vsel %vm553_vm1, %v1109_v17, 0 }
 0x510   :  { %v4826_v31 = vand.u32 4294901760, %v2199_v16  ;;  %v2436_v59 = vand.u32 4294901760, %v4833_v29 }
 0x512   :  { %v4836_v49 = vsub.f32 %v2199_v16, %v4826_v31 }
 0x514   :  { %v2223_v58 = vand.u32 4294901760, %v4836_v49 }
 0x565   :  { %v1735_v43 = vpop.f32.mrf.mxu1 }
 0x56c   :  { %v1704_v47 = vpop.f32.mrf.mxu0  ;;  %v1761_v39 = vpop.f32.mrf.mxu2 }
 0x56d   :  { %v1736_v8 = vadd.f32 %v1735_v43, %v1704_v47  ;;  %v1836_v60 = vpop.f32.mrf.mxu1  ;;  %v4845_v43 = vand.u32 4294901760, %v2202_v52 }
 0x56e   :  { %v1786_v62 = vpop.f32.mrf.mxu3 }
 0x56f   :  { %v1762_v63 = vadd.f32 %v1761_v39, %v1736_v8 }
 0x571   :  { %v1787_v4 = vadd.f32 %v1786_v62, %v1762_v63  ;;  %v2437_v63 = vsub.f32 %v4833_v29, %v2436_v59  ;;  %v2224_v62 = vsub.f32 %v4836_v49, %v2223_v58 }
 0x574   :  { %v1813_v45 = vpop.f32.mrf.mxu0 }
 0x575   :  { %v1814_v44 = vadd.f32 %v1813_v45, %v1787_v4  ;;  %v4853_v4 = vsub.f32 %v2202_v52, %v4845_v43 }
 0x577   :  { %v1837_v7 = vadd.f32 %v1836_v60, %v1814_v44  ;;  %v2557_v44 = vpop.permute.xlu1 %2556  ;;  %v2231_v51 = vand.u32 4294901760, %v4853_v4 }
 0x578   :  { %v2562_v3 = vsel %vm553_vm1, %v2557_v44, 0 }
 0x579   :  { %v2012_v50 = vsel %vm553_vm1, %v1837_v7, 0  ;;  %v2438_v7 = vand.u32 4294901760, %v2437_v63  ;;  %v2578_v19 = vand.u32 4294901760, %v2562_v3  ;;  %v2232_v9 = vsub.f32 %v4853_v4, %v2231_v51 }
 0x57a   :  { %v4807_v6 = vand.u32 4294901760, %v2012_v50 }
 0x57b   :  { %v2233_v17 = vand.u32 4294901760, %v2232_v9 }
 0x57c   :  { %v2035_v56 = vsub.f32 %v2012_v50, %v4807_v6  ;;  %2073 = vmatmul.f32.vlgmr.msrb.gmra.mxu1 %v4807_v6  ;;  %v2225_v50 = vand.u32 4294901760, %v2224_v62 }
 0x57d   :  { %2313 = vmatpush.msrb.mxu1 %v4792_v30  ;;  %v1929_v15 = vpop.f32.mrf.mxu0 }
 0x57e   :  { %v2036_v55 = vand.u32 4294901760, %v2035_v56  ;;  %2101 = vmatmul.f32.vlgmr.msrb.gmra.mxu2 %v2035_v56  ;;  %v1872_v61 = vpop.f32.mrf.mxu2 }
 0x57f   :  { %2345 = vmatpush.msrb.mxu2 %v2255_v38 }
 0x580   :  { %v2037_v10 = vsub.f32 %v2035_v56, %v2036_v55  ;;  %2130 = vmatmul.f32.vlgmr.msrb.gmra.mxu3 %v2036_v55  ;;  %v2555_v56 = vpop.permute.xlu2 %2554 }
 0x581   :  { %2371 = vmatpush.msrb.mxu3 %v4792_v30  ;;  %v1954_v30 = vpop.f32.mrf.mxu1  ;;  %v2560_v57 = vsel %vm553_vm1, %v2555_v56, 0 }
 0x582   :  { %v2038_v27 = vand.u32 4294901760, %v2037_v10  ;;  %v2580_v10 = vand.u32 4294901760, %v2560_v57 }
 0x584   :  { %2039 = vmatmul.f32.vlgmr.msrb.gmra.mxu0 %v2038_v27  ;;  %v2382_v27 = vpop.permute.xlu0 %2381  ;;  %v2612_v22 = vsub.f32 %v2560_v57, %v2580_v10 }
 0x585   :  { %v1903_v12 = vpop.f32.mrf.mxu3  ;;  %2285 = vmatpush.msrb.mxu0 %v4795_v21  ;;  %v4830_v21 = vand.u32 4294901760, %v2389_v48  ;;  %v2387_v23 = vsel %vm553_vm1, %v2382_v27, 0 }
 0x586   :  { %v1904_v26 = vadd.f32 %v1903_v12, %v1872_v61  ;;  %v1981_v2 = vpop.f32.mrf.mxu2  ;;  %v2606_v61 = vsub.f32 %v2562_v3, %v2578_v19  ;;  %v2613_v12 = vand.u32 4294901760, %v2612_v22  ;;  %v2411_v54 = vand.u32 4294901760, %v2387_v23 }
 0x587   :  { %v4841_v41 = vsub.f32 %v2389_v48, %v4830_v21 }
 0x588   :  { %v1930_v0 = vadd.f32 %v1929_v15, %v1904_v26  ;;  %v2607_v25 = vand.u32 4294901760, %v2606_v61  ;;  %v2614_v16 = vsub.f32 %v2612_v22, %v2613_v12 }
 0x589   :  { %v2442_v39 = vand.u32 4294901760, %v4841_v41 }
 0x58a   :  { %v1955_v35 = vadd.f32 %v1954_v30, %v1930_v0  ;;  %v2608_v26 = vsub.f32 %v2606_v61, %v2607_v25  ;;  %v2615_v0 = vand.u32 4294901760, %v2614_v16 }
 0x58b   :  { %v2443_v14 = vsub.f32 %v4841_v41, %v2442_v39 }
 0x58c   :  { %v1982_v34 = vadd.f32 %v1981_v2, %v1955_v35  ;;  %v2609_v15 = vand.u32 4294901760, %v2608_v26 }
 0x58d   :  { %v2004_v20 = vpop.f32.mrf.mxu3  ;;  %v2444_v55 = vand.u32 4294901760, %v2443_v14 }
 0x58e   :  { %v2005_v53 = vadd.f32 %v2004_v20, %v1982_v34 }
 0x590   :  { %v2015_v38 = vsel %vm553_vm1, %v2005_v53, 0 }
 0x591   :  { %v2042_v40 = vand.u32 4294901760, %v2015_v38 }
 0x593   :  { %v2043_v47 = vsub.f32 %v2015_v38, %v2042_v40  ;;  %2077 = vmatmul.f32.gmra.mxu1 %v2042_v40 }
 0x595   :  { %2106 = vmatmul.f32.gmra.mxu2 %v2043_v47  ;;  %v2044_v8 = vand.u32 4294901760, %v2043_v47 }
 0x597   :  { %2136 = vmatmul.f32.gmra.mxu3 %v2044_v8  ;;  %v2045_v45 = vsub.f32 %v2043_v47, %v2044_v8 }
 0x599   :  { %v2046_v60 = vand.u32 4294901760, %v2045_v45 }
 0x59b   :  { %2047 = vmatmul.f32.gmra.mxu0 %v2046_v60  ;;  %2186 = vmatmul.f32.vlgmr.msra.gmra.mxu1 %v4807_v6 }
 0x59c   :  { %2439 = vmatpush.xpose.msra.mxu1 %v2438_v7 }
 0x59d   :  { %2226 = vmatmul.f32.vlgmr.msra.gmra.mxu2 %v2225_v50 }
 0x59e   :  { %2467 = vmatpush.xpose.msra.mxu2 %v4833_v29 }
 0x59f   :  { %2260 = vmatmul.f32.vlgmr.msra.gmra.mxu3 %v4826_v31 }
 0x5a0   :  { %2445 = vmatpush.xpose.msra.mxu1 %v2444_v55  ;;  %2492 = vmatpush.xpose.msra.mxu3 %v4824_v32 }
 0x5a2   :  { %2470 = vmatpush.xpose.msra.mxu2 %v4841_v41 }
 0x5a3   :  { %2160 = vmatmul.f32.vlgmr.msra.gmra.mxu0 %v4807_v6  ;;  %2190 = vmatmul.f32.gmra.mxu1 %v2042_v40  ;;  %v2553_v6 = vpop.permute.xlu0 %2552 }
 0x5a4   :  { %2408 = vmatpush.xpose.msra.mxu0 %v4824_v32  ;;  %2494 = vmatpush.xpose.msra.mxu3 %v4830_v21  ;;  %v2558_v13 = vsel %vm553_vm1, %v2553_v6, 0 }
 0x5a5   :  { %2234 = vmatmul.f32.gmra.mxu2 %v2233_v17  ;;  %v2582_v30 = vand.u32 4294901760, %v2558_v13 }
 0x5a7   :  { %2264 = vmatmul.f32.gmra.mxu3 %v4845_v43  ;;  %v2583_v35 = vsub.f32 %v2558_v13, %v2582_v30 }
 0x5a8   :  { %2410 = vmatpush.xpose.msra.mxu0 %v4830_v21 }
 0x5a9   :  { %v2584_v48 = vand.u32 4294901760, %v2583_v35 }
 0x5ab   :  { %2164 = vmatmul.f32.gmra.mxu0 %v2042_v40  ;;  %2317 = vmatmul.f32.vlgmr.msrb.gmra.mxu1 %v2223_v58  ;;  %v2585_v33 = vsub.f32 %v2583_v35, %v2584_v48 }
 0x5ac   :  { %2544 = vmatpush.xpose.msrb.mxu1 %v4824_v32  ;;  %v2412_v32 = vsub.f32 %v2387_v23, %v2411_v54 }
 0x5ad   :  { %2347 = vmatmul.f32.vlgmr.msrb.gmra.mxu2 %v4826_v31  ;;  %v2586_v20 = vand.u32 4294901760, %v2585_v33 }
 0x5ae   :  { %2579 = vmatpush.xpose.msrb.mxu2 %v2578_v19 }
 0x5af   :  { %2373 = vmatmul.f32.vlgmr.msrb.gmra.mxu3 %v4826_v31  ;;  %v2413_v31 = vand.u32 4294901760, %v2412_v32 }
 0x5b0   :  { %2546 = vmatpush.xpose.msrb.mxu1 %v4830_v21  ;;  %2610 = vmatpush.xpose.msrb.mxu3 %v2609_v15 }
 0x5b1   :  { %v2414_v2 = vsub.f32 %v2412_v32, %v2413_v31 }
 0x5b2   :  { %2581 = vmatpush.xpose.msrb.mxu2 %v2580_v10 }
 0x5b3   :  { %2288 = vmatmul.f32.vlgmr.msrb.gmra.mxu0 %v4836_v49  ;;  %2323 = vmatmul.f32.gmra.mxu1 %v2231_v51  ;;  %v2415_v34 = vand.u32 4294901760, %v2414_v2 }
 0x5b4   :  { %2519 = vmatpush.xpose.msrb.mxu0 %v2436_v59  ;;  %2616 = vmatpush.xpose.msrb.mxu3 %v2615_v0 }
 0x5b5   :  { %2351 = vmatmul.f32.gmra.mxu2 %v4845_v43 }
 0x5b7   :  { %2377 = vmatmul.f32.gmra.mxu3 %v4845_v43 }
 0x5b8   :  { %2523 = vmatpush.xpose.msrb.mxu0 %v2442_v39 }
 0x5bb   :  { %2293 = vmatmul.f32.gmra.mxu0 %v4853_v4  ;;  %2447 = vmatmul.f32.vlgmr.msra.gmra.mxu1 %v2411_v54 }
 0x5bc   :  { %2663 = vmatpush.xpose.msra.mxu1 %v2578_v19 }
 0x5bd   :  { %2473 = vmatmul.f32.vlgmr.msra.gmra.mxu2 %v2412_v32 }
 0x5be   :  { %2690 = vmatpush.xpose.msra.mxu2 %v2607_v25 }
 0x5bf   :  { %2498 = vmatmul.f32.vlgmr.msra.gmra.mxu3 %v2413_v31 }
 0x5c0   :  { %2665 = vmatpush.xpose.msra.mxu1 %v2580_v10  ;;  %2715 = vmatpush.xpose.msra.mxu3 %v2578_v19 }
 0x5c2   :  { %2694 = vmatpush.xpose.msra.mxu2 %v2613_v12 }
 0x5c3   :  { %2416 = vmatmul.f32.vlgmr.msra.gmra.mxu0 %v2415_v34  ;;  %2548 = vmatmul.f32.vlgmr.msrb.gmra.mxu1 %v2411_v54 }
 0x5c4   :  { %2638 = vmatpush.xpose.msra.mxu0 %v2606_v61  ;;  %2717 = vmatpush.xpose.msra.mxu3 %v2580_v10 }
 0x5c5   :  { %2587 = vmatmul.f32.vlgmr.msrb.gmra.mxu2 %v2586_v20 }
 0x5c7   :  { %2618 = vmatmul.f32.vlgmr.msrb.gmra.mxu3 %v2582_v30 }
 0x5c8   :  { %2641 = vmatpush.xpose.msra.mxu0 %v2612_v22 }
 0x5cb   :  { %2525 = vmatmul.f32.vlgmr.msrb.gmra.mxu0 %v2411_v54  ;;  %2669 = vmatmul.f32.vlgmr.msra.gmra.mxu1 %v2584_v48 }
 0x5cd   :  { %2696 = vmatmul.f32.vlgmr.msra.gmra.mxu2 %v2582_v30 }
 0x5cf   :  { %2719 = vmatmul.f32.vlgmr.msra.gmra.mxu3 %v2582_v30 }
 0x5d3   :  { %2644 = vmatmul.f32.vlgmr.msra.gmra.mxu0 %v2583_v35 }
 0x5f9   :  { %v2074_v21 = vpop.f32.mrf.mxu1 }
 0x601   :  { %v2040_v29 = vpop.f32.mrf.mxu0  ;;  %v2102_v49 = vpop.f32.mrf.mxu2 }
 0x602   :  { %v2075_v53 = vadd.f32 %v2074_v21, %v2040_v29 }
 0x603   :  { %v2131_v38 = vpop.f32.mrf.mxu3 }
 0x604   :  { %v2103_v52 = vadd.f32 %v2102_v49, %v2075_v53 }
 0x606   :  { %v2132_v40 = vadd.f32 %v2131_v38, %v2103_v52 }
 0x610   :  { %v2078_v41 = vpop.f32.mrf.mxu1 }
 0x618   :  { %v2048_v59 = vpop.f32.mrf.mxu0  ;;  %v2107_v58 = vpop.f32.mrf.mxu2 }
 0x619   :  { %v2079_v43 = vadd.f32 %v2078_v41, %v2048_v59  ;;  %v2187_v47 = vpop.f32.mrf.mxu1 }
 0x61a   :  { %v2137_v8 = vpop.f32.mrf.mxu3 }
 0x61b   :  { %v2108_v39 = vadd.f32 %v2107_v58, %v2079_v43 }
 0x61d   :  { %v2138_v63 = vadd.f32 %v2137_v8, %v2108_v39 }
 0x620   :  { %v2161_v62 = vpop.f32.mrf.mxu0  ;;  %v2227_v4 = vpop.f32.mrf.mxu2 }
 0x621   :  { %v2162_v45 = vadd.f32 %v2161_v62, %v2132_v40  ;;  %v2191_v44 = vpop.f32.mrf.mxu1 }
 0x622   :  { %v2261_v60 = vpop.f32.mrf.mxu3 }
 0x623   :  { %v2188_v7 = vadd.f32 %v2187_v47, %v2162_v45 }
 0x625   :  { %v2228_v14 = vadd.f32 %v2227_v4, %v2188_v7  ;;  %v4340_v4 = vld [vmem:[%s4994_s1 + $0x10] sm:$0xff] }
 0x627   :  { %v2262_v50 = vadd.f32 %v2261_v60, %v2228_v14  ;;  %v2772_v14 = vpop.permute.xlu0 %2771 }
 0x628   :  { %v2165_v3 = vpop.f32.mrf.mxu0  ;;  %v2235_v51 = vpop.f32.mrf.mxu2 }
 0x629   :  { %v2166_v56 = vadd.f32 %v2165_v3, %v2138_v63  ;;  %v2318_v19 = vpop.f32.mrf.mxu1 }
 0x62a   :  { %v2265_v55 = vpop.f32.mrf.mxu3 }
 0x62b   :  { %v2192_v57 = vadd.f32 %v2191_v44, %v2166_v56  ;;  %v2796_v56 = vand.u32 4294901760, %v2772_v14 }
 0x62d   :  { %v2236_v9 = vadd.f32 %v2235_v51, %v2192_v57 }
 0x62f   :  { %v2266_v10 = vadd.f32 %v2265_v55, %v2236_v9  ;;  %v2828_v55 = vsub.f32 %v2772_v14, %v2796_v56 }
 0x630   :  { %v2289_v61 = vpop.f32.mrf.mxu0  ;;  %v2348_v27 = vpop.f32.mrf.mxu2 }
 0x631   :  { %v2290_v17 = vadd.f32 %v2289_v61, %v2262_v50  ;;  %v2324_v12 = vpop.f32.mrf.mxu1 }
 0x632   :  { %v2374_v22 = vpop.f32.mrf.mxu3 }
 0x633   :  { %v2319_v25 = vadd.f32 %v2318_v19, %v2290_v17 }
 0x635   :  { %v2349_v26 = vadd.f32 %v2348_v27, %v2319_v25 }
 0x637   :  { %v4886_v6 = vadd.f32 %v2374_v22, %v2349_v26 }
 0x638   :  { %v2294_v23 = vpop.f32.mrf.mxu0  ;;  %v2352_v15 = vpop.f32.mrf.mxu2 }
 0x639   :  { %v2295_v16 = vadd.f32 %v2294_v23, %v2266_v10  ;;  %v2448_v30 = vpop.f32.mrf.mxu1  ;;  %v2829_v10 = vand.u32 4294901760, %v2828_v55 }
 0x63a   :  { %v2378_v13 = vpop.f32.mrf.mxu3 }
 0x63b   :  { %v2325_v54 = vadd.f32 %v2324_v12, %v2295_v16  ;;  %v2830_v22 = vsub.f32 %v2828_v55, %v2829_v10 }
 0x63d   :  { %v2353_v0 = vadd.f32 %v2352_v15, %v2325_v54  ;;  %v2831_v12 = vand.u32 4294901760, %v2830_v22 }
 0x63f   :  { %v4888_v32 = vadd.f32 %v2378_v13, %v2353_v0 }
 0x640   :  { %v2417_v35 = vpop.f32.mrf.mxu0  ;;  %v2474_v31 = vpop.f32.mrf.mxu2 }
 0x641   :  { %v2449_v48 = vadd.f32 %v2448_v30, %v2417_v35  ;;  %v2549_v20 = vpop.f32.mrf.mxu1 }
 0x642   :  { %v2499_v2 = vpop.f32.mrf.mxu3 }
 0x643   :  { %v2475_v33 = vadd.f32 %v2474_v31, %v2449_v48 }
 0x645   :  { %v2500_v34 = vadd.f32 %v2499_v2, %v2475_v33 }
 0x648   :  { %v2526_v21 = vpop.f32.mrf.mxu0  ;;  %v2588_v53 = vpop.f32.mrf.mxu2 }
 0x649   :  { %v2527_v29 = vadd.f32 %v2526_v21, %v2500_v34  ;;  %v2670_v58 = vpop.f32.mrf.mxu1 }
 0x64a   :  { %v2619_v52 = vpop.f32.mrf.mxu3 }
 0x64b   :  { %v2550_v49 = vadd.f32 %v2549_v20, %v2527_v29  ;;  %v2620_v40 = vadd.f32 %v2619_v52, %v2588_v53 }
 0x64d   :  { %v2723_v38 = vsel %vm892_vm2, %v2550_v49, -inf }
 0x64e   :  { %2724 = vmax.xlane.f32.xlu1 %v2723_v38 }
 0x650   :  { %v2645_v41 = vpop.f32.mrf.mxu0  ;;  %v2697_v47 = vpop.f32.mrf.mxu2 }
 0x651   :  { %v2646_v59 = vadd.f32 %v2645_v41, %v2620_v40 }
 0x652   :  { %v2720_v39 = vpop.f32.mrf.mxu3 }
 0x653   :  { %v2671_v43 = vadd.f32 %v2670_v58, %v2646_v59 }
 0x655   :  { %v2698_v8 = vadd.f32 %v2697_v47, %v2671_v43 }
 0x657   :  { %v2721_v63 = vadd.f32 %v2720_v39, %v2698_v8 }
 0x659   :  { %v2726_v62 = vsel %vm892_vm2, %v2721_v63, -inf }
 0x65a   :  { %2727 = vmax.xlane.f32.xlu2 %v2726_v62 }
 0x672   :  { %2773 = vrot.lane.b32.xlu2 %v4619_v37, %s4350_s24 }
 0x67a   :  { %3108 = vrot.lane.b32.xlu2 %v4340_v4, %s4343_s15 }
 0x682   :  { %3296 = vrot.lane.b32.xlu2 %v4579_v1, %s4352_s30 }
 0x68a   :  { %3467 = vrot.lane.b32.xlu2 %v4594_v18, %s4352_s30 }
 0x6c1   :  { %v2725_v45 = vpop.xlane.xlu1 %2724 }
 0x6c2   :  { %v2729_v44 = vsub.f32 %v2550_v49, %v2725_v45 }
 0x6c4   :  { %v2731_v60 = vmul.f32 1.442695, %v2729_v44 }
 0x6c6   :  { %4316 = vpow2.f32 %v2731_v60 }
 0x6cc   :  { %v4317_v7 = vpop.eup %4316 }
 0x6cd   :  { %v2728_v50 = vpop.xlane.xlu2 %2727  ;;  %v2735_v3 = vsel %vm892_vm2, %v4317_v7, 0.0 }
 0x6ce   :  { %v2730_v51 = vsub.f32 %v2721_v63, %v2728_v50  ;;  %2736 = vadd.xlane.f32.xlu0 %v2735_v3 }
 0x6d0   :  { %v2733_v19 = vmul.f32 1.442695, %v2730_v51 }
 0x6d2   :  { %4318 = vpow2.f32 %v2733_v19 }
 0x6d5   :  { %v2774_v57 = vpop.permute.xlu2 %2773 }
 0x6d6   :  { %v2794_v9 = vand.u32 4294901760, %v2774_v57 }
 0x6d8   :  { %v4901_v1 = vpop.eup %4318  ;;  %v2822_v18 = vsub.f32 %v2774_v57, %v2794_v9  ;;  %2795 = vmatpush.msrb.mxu0 %v2794_v9  ;;  %2879 = vmatpush.msrb.mxu3 %v2794_v9 }
 0x6d9   :  { %v2738_v61 = vsel %vm892_vm2, %v4901_v1, 0.0 }
 0x6da   :  { %v2823_v27 = vand.u32 4294901760, %v2822_v18  ;;  %2797 = vmatpush.msrb.mxu0 %v2796_v56  ;;  %2854 = vmatpush.msrb.mxu2 %v2822_v18 }
 0x6db   :  { %2881 = vmatpush.msrb.mxu3 %v2796_v56  ;;  %2739 = vadd.xlane.f32.xlu1 %v2738_v61 }
 0x6dc   :  { %v2824_v17 = vsub.f32 %v2822_v18, %v2823_v27  ;;  %2857 = vmatpush.msrb.mxu2 %v2828_v55  ;;  %2906 = vmatpush.msra.mxu0 %v2823_v27 }
 0x6dd   :  { %v3109_v52 = vpop.permute.xlu2 %3108 }
 0x6de   :  { %v2825_v25 = vand.u32 4294901760, %v2824_v17  ;;  %2910 = vmatpush.msra.mxu0 %v2829_v10  ;;  %v4914_v41 = vand.u32 4294901760, %v3109_v52 }
 0x6e0   :  { %2826 = vmatpush.msrb.mxu1 %v2825_v25  ;;  %v3167_v63 = vsub.f32 %v3109_v52, %v4914_v41 }
 0x6e2   :  { %2832 = vmatpush.msrb.mxu1 %v2831_v12  ;;  %2939 = vrot.lane.b32.xlu0 %v4668_v28, %s4350_s24  ;;  %v3168_v45 = vand.u32 4294901760, %v3167_v63 }
 0x6e4   :  { %2931 = vmatpush.msra.mxu1 %v2794_v9  ;;  %v3169_v50 = vsub.f32 %v3167_v63, %v3168_v45 }
 0x6e6   :  { %2933 = vmatpush.msra.mxu1 %v2796_v56  ;;  %v3170_v9 = vand.u32 4294901760, %v3169_v50 }
 0x6ea   :  { %3298 = vrot.lane.b32.xlu0 %v4562_v11, %s4353_s4 }
 0x6f2   :  { %3469 = vrot.lane.b32.xlu0 %v4568_v36, %s4353_s4 }
 0x6f4   :  { %2941 = vrot.lane.b32.xlu1 %v4625_v46, %s4350_s24 }
 0x6fc   :  { %3300 = vrot.lane.b32.xlu1 %v4565_v24, %s4353_s4 }
 0x704   :  { %3471 = vrot.lane.b32.xlu1 %v4571_v42, %s4353_s4 }
 0x741   :  { %v2737_v26 = vpop.xlane.xlu0 %2736 }
 0x742   :  { %4320 = vrcp.f32 %v2737_v26  ;;  %v2752_v13 = vand.u32 2147483648, %v2737_v26  ;;  %v2750_v0 = vand.u32 2147483647, %v2737_v26  ;;  %vm2746_vm7 = vweird.f32 %v2737_v26 }
 0x744   :  { %v2753_v36 = vor.u32 1.1754944e-38, %v2752_v13  ;;  %vm2751_vm9 = vcmp.eq.f32.partialorder %v2750_v0, 8.507059e+37 }
 0x748   :  { %v4321_v23 = vpop.eup %4320 }
 0x749   :  { %v2742_v15 = vmul.f32 %v4321_v23, %v2737_v26  ;;  %vm2747_vm6 = vweird.f32 %v4321_v23 }
 0x74a   :  { %vm2748_vm8 = vmor %vm2746_vm7, %vm2747_vm6 }
 0x74b   :  { %v2743_v16 = vsub.f32 1.0, %v2742_v15 }
 0x74d   :  { %v2744_v54 = vmul.f32 %v4321_v23, %v2743_v16 }
 0x74e   :  { %v2740_v30 = vpop.xlane.xlu1 %2739 }
 0x74f   :  { %v2745_v11 = vadd.f32 %v4321_v23, %v2744_v54  ;;  %4322 = vrcp.f32 %v2740_v30  ;;  %v2767_v21 = vand.u32 2147483648, %v2740_v30  ;;  %v2765_v53 = vand.u32 2147483647, %v2740_v30 }
 0x750   :  { %vm2761_vm11 = vweird.f32 %v2740_v30 }
 0x751   :  { %v2749_v35 = vsel %vm2748_vm8, %v4321_v23, %v2745_v11  ;;  %v2768_v59 = vor.u32 1.1754944e-38, %v2767_v21  ;;  %vm2766_vm13 = vcmp.eq.f32.partialorder %v2765_v53, 8.507059e+37 }
 0x752   :  { %v2754_v24 = vsel %vm2751_vm9, %v2753_v36, %v2749_v35 }
 0x753   :  { %v2755_v31 = vmul.f32 %v4317_v7, %v2754_v24 }
 0x754   :  { %v2940_v43 = vpop.permute.xlu0 %2939 }
 0x755   :  { %v4323_v42 = vpop.eup %4322  ;;  %v2778_v48 = vsel %vm892_vm2, %v2755_v31, 0  ;;  %v2964_v62 = vand.u32 4294901760, %v2940_v43 }
 0x756   :  { %v2757_v2 = vmul.f32 %v4323_v42, %v2740_v30  ;;  %v2798_v33 = vand.u32 4294901760, %v2778_v48  ;;  %vm2762_vm10 = vweird.f32 %v4323_v42 }
 0x757   :  { %vm2763_vm12 = vmor %vm2761_vm11, %vm2762_vm10  ;;  %v2996_v7 = vsub.f32 %v2940_v43, %v2964_v62 }
 0x758   :  { %v2758_v34 = vsub.f32 1.0, %v2757_v2  ;;  %2834 = vmatmul.f32.vlgmr.msrb.gmra.mxu1 %v2798_v33  ;;  %v2799_v20 = vsub.f32 %v2778_v48, %v2798_v33 }
 0x759   :  { %v2997_v57 = vand.u32 4294901760, %v2996_v7 }
 0x75a   :  { %v2759_v29 = vmul.f32 %v4323_v42, %v2758_v34  ;;  %2860 = vmatmul.f32.vlgmr.msrb.gmra.mxu2 %v2799_v20  ;;  %v2800_v49 = vand.u32 4294901760, %v2799_v20 }
 0x75b   :  { %v2998_v27 = vsub.f32 %v2996_v7, %v2997_v57 }
 0x75c   :  { %v2760_v38 = vadd.f32 %v4323_v42, %v2759_v29  ;;  %2885 = vmatmul.f32.vlgmr.msrb.gmra.mxu3 %v2800_v49  ;;  %v2801_v40 = vsub.f32 %v2799_v20, %v2800_v49  ;;  %v3299_v56 = vpop.permute.xlu0 %3298 }
 0x75d   :  { %v3304_v10 = vsel %vm553_vm1, %v3299_v56, 0  ;;  %v2999_v23 = vand.u32 4294901760, %v2998_v27 }
 0x75e   :  { %v2764_v58 = vsel %vm2763_vm12, %v4323_v42, %v2760_v38  ;;  %v2802_v47 = vand.u32 4294901760, %v2801_v40  ;;  %v3324_v22 = vand.u32 4294901760, %v3304_v10 }
 0x75f   :  { %v2769_v8 = vsel %vm2766_vm13, %v2768_v59, %v2764_v58  ;;  %v3297_v58 = vpop.permute.xlu2 %3296 }
 0x760   :  { %v2770_v39 = vmul.f32 %v4901_v1, %v2769_v8  ;;  %2803 = vmatmul.f32.vlgmr.msrb.gmra.mxu0 %v2802_v47  ;;  %2935 = vmatmul.f32.vlgmr.msra.gmra.mxu1 %v2798_v33  ;;  %v3356_v16 = vsub.f32 %v3304_v10, %v3324_v22 }
 0x762   :  { %v2946_v4 = vsel %vm892_vm2, %v2770_v39, 0  ;;  %v3357_v54 = vand.u32 4294901760, %v3356_v16  ;;  %v3302_v39 = vsel %vm553_vm1, %v3297_v58, 0 }
 0x763   :  { %v2966_v44 = vand.u32 4294901760, %v2946_v4 }
 0x764   :  { %v3358_v11 = vsub.f32 %v3356_v16, %v3357_v54 }
 0x765   :  { %v2967_v60 = vsub.f32 %v2946_v4, %v2966_v44 }
 0x766   :  { %v2942_v14 = vpop.permute.xlu1 %2941  ;;  %v3359_v36 = vand.u32 4294901760, %v3358_v11 }
 0x767   :  { %v2962_v3 = vand.u32 4294901760, %v2942_v14  ;;  %v2968_v51 = vand.u32 4294901760, %v2967_v60  ;;  %v3468_v27 = vpop.permute.xlu2 %3467 }
 0x768   :  { %2912 = vmatmul.f32.vlgmr.msra.gmra.mxu0 %v2798_v33 }
 0x769   :  { %v2990_v19 = vsub.f32 %v2942_v14, %v2962_v3  ;;  %2963 = vmatpush.msra.mxu2 %v2962_v3  ;;  %3047 = vmatpush.msrb.mxu1 %v2962_v3  ;;  %v2969_v55 = vsub.f32 %v2967_v60, %v2968_v51  ;;  %v3470_v14 = vpop.permute.xlu0 %3469 }
 0x76b   :  { %v2991_v1 = vand.u32 4294901760, %v2990_v19  ;;  %2965 = vmatpush.msra.mxu2 %v2964_v62  ;;  %3022 = vmatpush.msrb.mxu0 %v2990_v19  ;;  %v2970_v18 = vand.u32 4294901760, %v2969_v55  ;;  %v3475_v55 = vsel %vm553_vm1, %v3470_v14, 0 }
 0x76c   :  { %3049 = vmatpush.msrb.mxu1 %v2964_v62 }
 0x76d   :  { %v2992_v61 = vsub.f32 %v2990_v19, %v2991_v1  ;;  %3053 = vmatmul.f32.vlgmr.msrb.gmra.mxu1 %v2968_v51  ;;  %2971 = vmatmul.f32.vlgmr.msra.gmra.mxu2 %v2970_v18 }
 0x76e   :  { %3025 = vmatpush.msrb.mxu0 %v2996_v7  ;;  %3074 = vmatpush.msrb.mxu2 %v2991_v1  ;;  %v3301_v17 = vpop.permute.xlu1 %3300  ;;  %v3495_v1 = vand.u32 4294901760, %v3475_v55 }
 0x76f   :  { %v2993_v25 = vand.u32 4294901760, %v2992_v61  ;;  %v3306_v12 = vsel %vm553_vm1, %v3301_v17, 0  ;;  %3171 = vmatpush.msra.mxu1 %v3170_v9 }
 0x770   :  { %3133 = vmatpush.msra.mxu0 %v4914_v41  ;;  %v3322_v26 = vand.u32 4294901760, %v3306_v12  ;;  %3078 = vmatpush.msrb.mxu2 %v2997_v57 }
 0x771   :  { %3028 = vmatmul.f32.vlgmr.msrb.gmra.mxu0 %v2967_v60  ;;  %2994 = vmatpush.msra.mxu3 %v2993_v25 }
 0x772   :  { %3198 = vmatpush.msra.mxu2 %v3167_v63  ;;  %v3350_v15 = vsub.f32 %v3306_v12, %v3322_v26  ;;  %3284 = vmatpush.msrb.mxu1 %v4914_v41 }
 0x773   :  { %3258 = vmatpush.msrb.mxu0 %v3168_v45  ;;  %3000 = vmatpush.msra.mxu3 %v2999_v23  ;;  %v3473_v23 = vsel %vm553_vm1, %v3468_v27, 0 }
 0x774   :  { %v3351_v13 = vand.u32 4294901760, %v3350_v15  ;;  %3002 = vmatmul.f32.vlgmr.msra.gmra.mxu3 %v2966_v44 }
 0x775   :  { %3099 = vmatpush.msrb.mxu3 %v2962_v3  ;;  %3080 = vmatmul.f32.vlgmr.msrb.gmra.mxu2 %v2966_v44 }
 0x776   :  { %3323 = vmatpush.xpose.msrb.mxu2 %v3322_v26  ;;  %v3352_v0 = vsub.f32 %v3350_v15, %v3351_v13  ;;  %v3472_v63 = vpop.permute.xlu1 %3471 }
 0x777   :  { %3101 = vmatpush.msrb.mxu3 %v2964_v62  ;;  %v3477_v60 = vsel %vm553_vm1, %v3472_v63, 0 }
 0x778   :  { %v3353_v30 = vand.u32 4294901760, %v3352_v0  ;;  %v3493_v51 = vand.u32 4294901760, %v3477_v60  ;;  %v3497_v0 = vand.u32 4294901760, %v3473_v23 }
 0x779   :  { %3226 = vmatpush.msra.mxu3 %v4914_v41 }
 0x77a   :  { %3325 = vmatpush.xpose.msrb.mxu2 %v3324_v22  ;;  %v3521_v18 = vsub.f32 %v3477_v60, %v3493_v51 }
 0x77c   :  { %3103 = vmatmul.f32.vlgmr.msrb.gmra.mxu3 %v2966_v44  ;;  %v3326_v44 = vand.u32 4294901760, %v3302_v39  ;;  %v3522_v25 = vand.u32 4294901760, %v3521_v18 }
 0x77d   :  { %3354 = vmatpush.xpose.msrb.mxu3 %v3353_v30 }
 0x77e   :  { %v3327_v19 = vsub.f32 %v3302_v39, %v3326_v44 }
 0x780   :  { %v3328_v10 = vand.u32 4294901760, %v3327_v19 }
 0x781   :  { %3360 = vmatpush.xpose.msrb.mxu3 %v3359_v36  ;;  %v3498_v36 = vsub.f32 %v3473_v23, %v3497_v0 }
 0x782   :  { %v3329_v12 = vsub.f32 %v3327_v19, %v3328_v10 }
 0x7d5   :  { %v2835_v35 = vpop.f32.mrf.mxu1 }
 0x7dd   :  { %v2804_v24 = vpop.f32.mrf.mxu0  ;;  %v2861_v42 = vpop.f32.mrf.mxu2 }
 0x7de   :  { %v2836_v31 = vadd.f32 %v2835_v35, %v2804_v24  ;;  %v2936_v21 = vpop.f32.mrf.mxu1  ;;  %v3499_v24 = vand.u32 4294901760, %v3498_v36 }
 0x7df   :  { %v2886_v2 = vpop.f32.mrf.mxu3 }
 0x7e0   :  { %v2862_v48 = vadd.f32 %v2861_v42, %v2836_v31  ;;  %v3500_v31 = vsub.f32 %v3498_v36, %v3499_v24 }
 0x7e2   :  { %v2887_v33 = vadd.f32 %v2886_v2, %v2862_v48  ;;  %v3501_v42 = vand.u32 4294901760, %v3500_v31 }
 0x7e5   :  { %v2913_v34 = vpop.f32.mrf.mxu0 }
 0x7e6   :  { %v2914_v20 = vadd.f32 %v2913_v34, %v2887_v33 }
 0x7e8   :  { %v2937_v29 = vadd.f32 %v2936_v21, %v2914_v20 }
 0x7ea   :  { %v3112_v53 = vsel %vm553_vm1, %v2937_v29, 0  ;;  %v3054_v4 = vpop.f32.mrf.mxu1 }
 0x7eb   :  { %v4925_v49 = vand.u32 4294901760, %v3112_v53 }
 0x7ed   :  { %v3135_v52 = vsub.f32 %v3112_v53, %v4925_v49  ;;  %3173 = vmatmul.f32.vlgmr.msra.gmra.mxu1 %v4925_v49 }
 0x7ee   :  { %3459 = vmatpush.xpose.msra.mxu1 %v3322_v26  ;;  %v3029_v8 = vpop.f32.mrf.mxu0 }
 0x7ef   :  { %v3136_v38 = vand.u32 4294901760, %v3135_v52  ;;  %3201 = vmatmul.f32.vlgmr.msra.gmra.mxu2 %v3135_v52 }
 0x7f0   :  { %3382 = vmatpush.xpose.msra.mxu2 %v3350_v15  ;;  %v2972_v59 = vpop.f32.mrf.mxu2 }
 0x7f1   :  { %v3137_v40 = vsub.f32 %v3135_v52, %v3136_v38  ;;  %3230 = vmatmul.f32.vlgmr.msra.gmra.mxu3 %v3136_v38 }
 0x7f2   :  { %3407 = vmatpush.xpose.msra.mxu3 %v3322_v26  ;;  %3461 = vmatpush.xpose.msra.mxu1 %v3324_v22 }
 0x7f3   :  { %v3138_v41 = vand.u32 4294901760, %v3137_v40 }
 0x7f4   :  { %3385 = vmatpush.xpose.msra.mxu2 %v3356_v16 }
 0x7f5   :  { %3139 = vmatmul.f32.vlgmr.msra.gmra.mxu0 %v3138_v41 }
 0x7f6   :  { %3409 = vmatpush.xpose.msra.mxu3 %v3324_v22  ;;  %3434 = vmatpush.xpose.msra.mxu0 %v3351_v13  ;;  %v3527_v22 = vsub.f32 %v3475_v55, %v3495_v1  ;;  %v3523_v13 = vsub.f32 %v3521_v18, %v3522_v25 }
 0x7f7   :  { %v3003_v43 = vpop.f32.mrf.mxu3 }
 0x7f8   :  { %v3004_v47 = vadd.f32 %v3003_v43, %v2972_v59  ;;  %v3081_v7 = vpop.f32.mrf.mxu2  ;;  %v3528_v16 = vand.u32 4294901760, %v3527_v22  ;;  %v3524_v30 = vand.u32 4294901760, %v3523_v13 }
 0x7fa   :  { %v3030_v62 = vadd.f32 %v3029_v8, %v3004_v47  ;;  %3438 = vmatpush.xpose.msra.mxu0 %v3357_v54  ;;  %v3330_v54 = vand.u32 4294901760, %v3329_v12  ;;  %v3529_v11 = vsub.f32 %v3527_v22, %v3528_v16 }
 0x7fc   :  { %v3055_v45 = vadd.f32 %v3054_v4, %v3030_v62  ;;  %v3530_v35 = vand.u32 4294901760, %v3529_v11 }
 0x7fe   :  { %v3082_v50 = vadd.f32 %v3081_v7, %v3055_v45 }
 0x7ff   :  { %v3104_v3 = vpop.f32.mrf.mxu3 }
 0x800   :  { %v3105_v56 = vadd.f32 %v3104_v3, %v3082_v50 }
 0x802   :  { %v3115_v57 = vsel %vm553_vm1, %v3105_v56, 0 }
 0x803   :  { %v3142_v9 = vand.u32 4294901760, %v3115_v57 }
 0x805   :  { %v3143_v61 = vsub.f32 %v3115_v57, %v3142_v9  ;;  %3177 = vmatmul.f32.gmra.mxu1 %v3142_v9 }
 0x807   :  { %3206 = vmatmul.f32.gmra.mxu2 %v3143_v61  ;;  %v3144_v17 = vand.u32 4294901760, %v3143_v61 }
 0x809   :  { %3236 = vmatmul.f32.gmra.mxu3 %v3144_v17  ;;  %v3145_v26 = vsub.f32 %v3143_v61, %v3144_v17 }
 0x80b   :  { %v3146_v15 = vand.u32 4294901760, %v3145_v26 }
 0x80d   :  { %3147 = vmatmul.f32.gmra.mxu0 %v3146_v15  ;;  %3286 = vmatmul.f32.vlgmr.msrb.gmra.mxu1 %v4925_v49 }
 0x80e   :  { %3578 = vmatpush.xpose.msrb.mxu1 %v3493_v51 }
 0x80f   :  { %3331 = vmatmul.f32.vlgmr.msrb.gmra.mxu2 %v3330_v54 }
 0x810   :  { %3494 = vmatpush.xpose.msrb.mxu2 %v3493_v51 }
 0x811   :  { %3362 = vmatmul.f32.vlgmr.msrb.gmra.mxu3 %v3326_v44 }
 0x812   :  { %3525 = vmatpush.xpose.msrb.mxu3 %v3524_v30  ;;  %3580 = vmatpush.xpose.msrb.mxu1 %v3495_v1 }
 0x814   :  { %3496 = vmatpush.xpose.msrb.mxu2 %v3495_v1 }
 0x815   :  { %3260 = vmatmul.f32.vlgmr.msrb.gmra.mxu0 %v4925_v49  ;;  %3290 = vmatmul.f32.gmra.mxu1 %v3142_v9 }
 0x816   :  { %3531 = vmatpush.xpose.msrb.mxu3 %v3530_v35  ;;  %3553 = vmatpush.xpose.msrb.mxu0 %v3521_v18 }
 0x817   :  { %3388 = vmatmul.f32.vlgmr.msra.gmra.mxu2 %v3327_v19 }
 0x818   :  { %3605 = vmatpush.xpose.msra.mxu2 %v3522_v25 }
 0x819   :  { %3413 = vmatmul.f32.vlgmr.msra.gmra.mxu3 %v3328_v10 }
 0x81a   :  { %3556 = vmatpush.xpose.msrb.mxu0 %v3527_v22  ;;  %3630 = vmatpush.xpose.msra.mxu3 %v3493_v51 }
 0x81c   :  { %3609 = vmatpush.xpose.msra.mxu2 %v3528_v16 }
 0x81d   :  { %3264 = vmatmul.f32.gmra.mxu0 %v3142_v9  ;;  %3463 = vmatmul.f32.vlgmr.msra.gmra.mxu1 %v3326_v44 }
 0x81e   :  { %3632 = vmatpush.xpose.msra.mxu3 %v3495_v1 }
 0x81f   :  { %3502 = vmatmul.f32.vlgmr.msrb.gmra.mxu2 %v3501_v42 }
 0x821   :  { %3533 = vmatmul.f32.vlgmr.msrb.gmra.mxu3 %v3497_v0 }
 0x825   :  { %3440 = vmatmul.f32.vlgmr.msra.gmra.mxu0 %v3326_v44  ;;  %3584 = vmatmul.f32.vlgmr.msrb.gmra.mxu1 %v3499_v24 }
 0x827   :  { %3611 = vmatmul.f32.vlgmr.msra.gmra.mxu2 %v3497_v0 }
 0x829   :  { %3634 = vmatmul.f32.vlgmr.msra.gmra.mxu3 %v3497_v0 }
 0x82d   :  { %3559 = vmatmul.f32.vlgmr.msrb.gmra.mxu0 %v3498_v36 }
 0x86a   :  { %v3174_v48 = vpop.f32.mrf.mxu1 }
 0x872   :  { %v3140_v2 = vpop.f32.mrf.mxu0  ;;  %v3202_v34 = vpop.f32.mrf.mxu2 }
 0x873   :  { %v3175_v33 = vadd.f32 %v3174_v48, %v3140_v2 }
 0x874   :  { %v3231_v21 = vpop.f32.mrf.mxu3 }
 0x875   :  { %v3203_v20 = vadd.f32 %v3202_v34, %v3175_v33  ;;  %v4341_v33 = vld [vmem:[%s4994_s1 + $0x18] sm:$0xff] }
 0x877   :  { %v3232_v29 = vadd.f32 %v3231_v21, %v3203_v20 }
 0x882   :  { %v3178_v53 = vpop.f32.mrf.mxu1 }
 0x88a   :  { %v3148_v49 = vpop.f32.mrf.mxu0  ;;  %v3207_v52 = vpop.f32.mrf.mxu2 }
 0x88b   :  { %v3179_v38 = vadd.f32 %v3178_v53, %v3148_v49  ;;  %v3287_v59 = vpop.f32.mrf.mxu1 }
 0x88c   :  { %v3237_v40 = vpop.f32.mrf.mxu3 }
 0x88d   :  { %v3208_v41 = vadd.f32 %v3207_v52, %v3179_v38 }
 0x88f   :  { %v3238_v58 = vadd.f32 %v3237_v40, %v3208_v41 }
 0x892   :  { %v3261_v43 = vpop.f32.mrf.mxu0  ;;  %v3332_v47 = vpop.f32.mrf.mxu2 }
 0x893   :  { %v3262_v8 = vadd.f32 %v3261_v43, %v3232_v29  ;;  %v3291_v4 = vpop.f32.mrf.mxu1 }
 0x894   :  { %v3363_v39 = vpop.f32.mrf.mxu3 }
 0x895   :  { %v3288_v63 = vadd.f32 %v3287_v59, %v3262_v8  ;;  %v3364_v60 = vadd.f32 %v3363_v39, %v3332_v47 }
 0x897   :  { %v4937_v62 = vadd.f32 %v3288_v63, %v4886_v6 }
 0x89a   :  { %v3265_v45 = vpop.f32.mrf.mxu0  ;;  %v3389_v44 = vpop.f32.mrf.mxu2 }
 0x89b   :  { %v3266_v7 = vadd.f32 %v3265_v45, %v3238_v58  ;;  %v3390_v3 = vadd.f32 %v3389_v44, %v3364_v60  ;;  %v3464_v19 = vpop.f32.mrf.mxu1 }
 0x89c   :  { %v3414_v14 = vpop.f32.mrf.mxu3 }
 0x89d   :  { %v3292_v50 = vadd.f32 %v3291_v4, %v3266_v7  ;;  %v3415_v56 = vadd.f32 %v3414_v14, %v3390_v3 }
 0x89f   :  { %v4940_v51 = vadd.f32 %v3292_v50, %v4888_v32 }
 0x8a2   :  { %v3441_v55 = vpop.f32.mrf.mxu0  ;;  %v3503_v9 = vpop.f32.mrf.mxu2 }
 0x8a3   :  { %v3442_v57 = vadd.f32 %v3441_v55, %v3415_v56  ;;  %v3585_v17 = vpop.f32.mrf.mxu1 }
 0x8a4   :  { %v3534_v18 = vpop.f32.mrf.mxu3 }
 0x8a5   :  { %v3465_v1 = vadd.f32 %v3464_v19, %v3442_v57  ;;  %v3535_v10 = vadd.f32 %v3534_v18, %v3503_v9 }
 0x8a7   :  { %v3638_v6 = vsel %vm892_vm2, %v3465_v1, -inf }
 0x8a8   :  { %3639 = vmax.xlane.f32.xlu1 %v3638_v6 }
 0x8aa   :  { %v3560_v61 = vpop.f32.mrf.mxu0  ;;  %v3612_v25 = vpop.f32.mrf.mxu2 }
 0x8ab   :  { %v3561_v27 = vadd.f32 %v3560_v61, %v3535_v10 }
 0x8ac   :  { %v3635_v26 = vpop.f32.mrf.mxu3 }
 0x8ad   :  { %v3586_v22 = vadd.f32 %v3585_v17, %v3561_v27 }
 0x8af   :  { %v3613_v12 = vadd.f32 %v3612_v25, %v3586_v22 }
 0x8b1   :  { %v3636_v32 = vadd.f32 %v3635_v26, %v3613_v12 }
 0x8b3   :  { %v3641_v23 = vsel %vm892_vm2, %v3636_v32, -inf }
 0x8b4   :  { %3642 = vmax.xlane.f32.xlu0 %v3641_v23 }
 0x8c8   :  { %3688 = vrot.lane.b32.xlu0 %v4619_v37, %s4354_s5 }
 0x8d0   :  { %3854 = vrot.lane.b32.xlu0 %v4668_v28, %s4354_s5 }
 0x91b   :  { %v3640_v15 = vpop.xlane.xlu1 %3639 }
 0x91c   :  { %v3644_v16 = vsub.f32 %v3465_v1, %v3640_v15 }
 0x91e   :  { %v3646_v13 = vmul.f32 1.442695, %v3644_v16 }
 0x920   :  { %4324 = vpow2.f32 %v3646_v13 }
 0x926   :  { %v4325_v54 = vpop.eup %4324 }
 0x927   :  { %v3643_v0 = vpop.xlane.xlu0 %3642  ;;  %v3650_v30 = vsel %vm892_vm2, %v4325_v54, 0.0 }
 0x928   :  { %v3645_v11 = vsub.f32 %v3636_v32, %v3643_v0  ;;  %3651 = vadd.xlane.f32.xlu2 %v3650_v30 }
 0x92a   :  { %v3648_v36 = vmul.f32 1.442695, %v3645_v11 }
 0x92c   :  { %4326 = vpow2.f32 %v3648_v36 }
 0x932   :  { %v4949_v35 = vpop.eup %4326 }
 0x933   :  { %v3653_v37 = vsel %vm892_vm2, %v4949_v35, 0.0 }
 0x934   :  { %3654 = vadd.xlane.f32.xlu1 %v3653_v37 }
 0x93a   :  { %v3689_v24 = vpop.permute.xlu0 %3688 }
 0x93b   :  { %v3709_v28 = vand.u32 4294901760, %v3689_v24 }
 0x93d   :  { %v3737_v31 = vsub.f32 %v3689_v24, %v3709_v28  ;;  %3710 = vmatpush.msra.mxu0 %v3709_v28  ;;  %3794 = vmatpush.msrb.mxu3 %v3709_v28 }
 0x93f   :  { %v3738_v42 = vand.u32 4294901760, %v3737_v31  ;;  %3769 = vmatpush.msrb.mxu2 %v3737_v31 }
 0x940   :  { %3686 = vrot.lane.b32.xlu2 %v4633_v5, %s4354_s5 }
 0x941   :  { %v3739_v48 = vsub.f32 %v3737_v31, %v3738_v42 }
 0x942   :  { %v3855_v1 = vpop.permute.xlu0 %3854 }
 0x943   :  { %v3740_v2 = vand.u32 4294901760, %v3739_v48  ;;  %v3879_v27 = vand.u32 4294901760, %v3855_v1 }
 0x945   :  { %3741 = vmatpush.msra.mxu1 %v3740_v2  ;;  %v3911_v25 = vsub.f32 %v3855_v1, %v3879_v27 }
 0x947   :  { %v3912_v13 = vand.u32 4294901760, %v3911_v25 }
 0x948   :  { %4023 = vrot.lane.b32.xlu2 %v4341_v33, %s4343_s15 }
 0x949   :  { %v3913_v11 = vsub.f32 %v3911_v25, %v3912_v13 }
 0x94d   :  { %3856 = vrot.lane.b32.xlu1 %v4625_v46, %s4354_s5 }
 0x99b   :  { %v3652_v34 = vpop.xlane.xlu2 %3651 }
 0x99c   :  { %4328 = vrcp.f32 %v3652_v34  ;;  %v3667_v5 = vand.u32 2147483648, %v3652_v34  ;;  %v3665_v40 = vand.u32 2147483647, %v3652_v34  ;;  %vm3661_vm15 = vweird.f32 %v3652_v34 }
 0x99e   :  { %v3668_v58 = vor.u32 1.1754944e-38, %v3667_v5  ;;  %vm3666_vm4 = vcmp.eq.f32.partialorder %v3665_v40, 8.507059e+37 }
 0x9a2   :  { %v4329_v20 = vpop.eup %4328 }
 0x9a3   :  { %v3657_v21 = vmul.f32 %v4329_v20, %v3652_v34  ;;  %v3687_v29 = vpop.permute.xlu2 %3686  ;;  %vm3662_vm14 = vweird.f32 %v4329_v20 }
 0x9a4   :  { %v3711_v53 = vand.u32 4294901760, %v3687_v29  ;;  %vm3663_vm3 = vmor %vm3661_vm15, %vm3662_vm14 }
 0x9a5   :  { %v3658_v49 = vsub.f32 1.0, %v3657_v21 }
 0x9a6   :  { %v3743_v52 = vsub.f32 %v3687_v29, %v3711_v53  ;;  %3712 = vmatpush.msra.mxu0 %v3711_v53  ;;  %3796 = vmatpush.msrb.mxu3 %v3711_v53 }
 0x9a7   :  { %v3659_v38 = vmul.f32 %v4329_v20, %v3658_v49  ;;  %v3655_v41 = vpop.xlane.xlu1 %3654 }
 0x9a8   :  { %3821 = vmatpush.msrb.mxu0 %v3738_v42  ;;  %4330 = vrcp.f32 %v3655_v41  ;;  %3772 = vmatpush.msrb.mxu2 %v3743_v52  ;;  %v3744_v46 = vand.u32 4294901760, %v3743_v52  ;;  %v3682_v14 = vand.u32 2147483648, %v3655_v41  ;;  %v3680_v56 = vand.u32 2147483647, %v3655_v41 }
 0x9a9   :  { %v3660_v59 = vadd.f32 %v4329_v20, %v3659_v38  ;;  %vm3676_vm6 = vweird.f32 %v3655_v41 }
 0x9aa   :  { %3825 = vmatpush.msrb.mxu0 %v3744_v46  ;;  %v3745_v47 = vsub.f32 %v3743_v52, %v3744_v46  ;;  %v3683_v57 = vor.u32 1.1754944e-38, %v3682_v14  ;;  %vm3681_vm8 = vcmp.eq.f32.partialorder %v3680_v56, 8.507059e+37 }
 0x9ab   :  { %v3664_v43 = vsel %vm3663_vm3, %v4329_v20, %v3660_v59  ;;  %v4024_v37 = vpop.permute.xlu2 %4023 }
 0x9ac   :  { %v3669_v8 = vsel %vm3666_vm4, %v3668_v58, %v3664_v43  ;;  %v3746_v63 = vand.u32 4294901760, %v3745_v47  ;;  %v4047_v24 = vand.u32 4294901760, %v4024_v37 }
 0x9ad   :  { %v3670_v39 = vmul.f32 %v4325_v54, %v3669_v8 }
 0x9ae   :  { %v4331_v4 = vpop.eup %4330  ;;  %3747 = vmatpush.msra.mxu1 %v3746_v63 }
 0x9af   :  { %v3672_v45 = vmul.f32 %v4331_v4, %v3655_v41  ;;  %v3693_v44 = vsel %vm892_vm2, %v3670_v39, 0  ;;  %vm3677_vm5 = vweird.f32 %v4331_v4 }
 0x9b0   :  { %3846 = vmatpush.msrb.mxu1 %v3709_v28  ;;  %v3713_v60 = vand.u32 4294901760, %v3693_v44  ;;  %vm3678_vm7 = vmor %vm3676_vm6, %vm3677_vm5  ;;  %v4082_v28 = vsub.f32 %v4024_v37, %v4047_v24 }
 0x9b1   :  { %v3673_v7 = vsub.f32 1.0, %v3672_v45 }
 0x9b2   :  { %3848 = vmatpush.msrb.mxu1 %v3711_v53  ;;  %v3714_v50 = vsub.f32 %v3693_v44, %v3713_v60  ;;  %v4083_v31 = vand.u32 4294901760, %v4082_v28 }
 0x9b3   :  { %v3674_v3 = vmul.f32 %v4331_v4, %v3673_v7  ;;  %3749 = vmatmul.f32.vlgmr.msra.gmra.mxu1 %v3713_v60 }
 0x9b4   :  { %3775 = vmatmul.f32.vlgmr.msrb.gmra.mxu2 %v3714_v50  ;;  %v3715_v19 = vand.u32 4294901760, %v3714_v50  ;;  %v4084_v42 = vsub.f32 %v4082_v28, %v4083_v31 }
 0x9b5   :  { %v3675_v55 = vadd.f32 %v4331_v4, %v3674_v3 }
 0x9b6   :  { %3800 = vmatmul.f32.vlgmr.msrb.gmra.mxu3 %v3715_v19  ;;  %v3716_v9 = vsub.f32 %v3714_v50, %v3715_v19  ;;  %v4085_v48 = vand.u32 4294901760, %v4084_v42 }
 0x9b7   :  { %v3679_v18 = vsel %vm3678_vm7, %v4331_v4, %v3675_v55 }
 0x9b8   :  { %v3684_v6 = vsel %vm3681_vm8, %v3683_v57, %v3679_v18  ;;  %v3717_v10 = vand.u32 4294901760, %v3716_v9 }
 0x9b9   :  { %v3685_v61 = vmul.f32 %v4949_v35, %v3684_v6  ;;  %v3914_v35 = vand.u32 4294901760, %v3913_v11 }
 0x9ba   :  { %3718 = vmatmul.f32.vlgmr.msra.gmra.mxu0 %v3717_v10 }
 0x9bb   :  { %v3861_v17 = vsel %vm892_vm2, %v3685_v61, 0  ;;  %3850 = vmatmul.f32.vlgmr.msrb.gmra.mxu1 %v3713_v60 }
 0x9bc   :  { %v3881_v22 = vand.u32 4294901760, %v3861_v17 }
 0x9be   :  { %v3882_v12 = vsub.f32 %v3861_v17, %v3881_v22 }
 0x9bf   :  { %v3857_v26 = vpop.permute.xlu1 %3856 }
 0x9c0   :  { %v3877_v32 = vand.u32 4294901760, %v3857_v26  ;;  %v3883_v23 = vand.u32 4294901760, %v3882_v12 }
 0x9c2   :  { %v3905_v15 = vsub.f32 %v3857_v26, %v3877_v32  ;;  %3827 = vmatmul.f32.vlgmr.msrb.gmra.mxu0 %v3713_v60  ;;  %3878 = vmatpush.msra.mxu2 %v3877_v32  ;;  %v3884_v16 = vsub.f32 %v3882_v12, %v3883_v23 }
 0x9c3   :  { %3962 = vmatpush.msra.mxu1 %v3877_v32 }
 0x9c4   :  { %v3906_v54 = vand.u32 4294901760, %v3905_v15  ;;  %3880 = vmatpush.msra.mxu2 %v3879_v27  ;;  %3937 = vmatpush.msra.mxu0 %v3905_v15  ;;  %v3885_v0 = vand.u32 4294901760, %v3884_v16 }
 0x9c5   :  { %3964 = vmatpush.msra.mxu1 %v3879_v27 }
 0x9c6   :  { %v3907_v30 = vsub.f32 %v3905_v15, %v3906_v54  ;;  %3968 = vmatmul.f32.vlgmr.msra.gmra.mxu1 %v3883_v23  ;;  %3886 = vmatmul.f32.vlgmr.msra.gmra.mxu2 %v3885_v0 }
 0x9c7   :  { %3940 = vmatpush.msra.mxu0 %v3911_v25  ;;  %3989 = vmatpush.msrb.mxu2 %v3906_v54  ;;  %v4969_v54 = vld [vmem:[%s4996_s2] sm:$0x3f] }
 0x9c8   :  { %v3908_v36 = vand.u32 4294901760, %v3907_v30  ;;  %4086 = vmatpush.msrb.mxu1 %v4085_v48  ;;  %v4211_v0 = vperm.slane %v4969_v54, 3 }
 0x9c9   :  { %3993 = vmatpush.msrb.mxu2 %v3912_v13  ;;  %4048 = vmatpush.msrb.mxu0 %v4047_v24 }
 0x9ca   :  { %3909 = vmatpush.msra.mxu3 %v3908_v36  ;;  %3943 = vmatmul.f32.vlgmr.msra.gmra.mxu0 %v3882_v12  ;;  %v14_v36 = vld [vmem:[%s4995_s0] sm:$0xff] }
 0x9cb   :  { %4113 = vmatpush.msra.mxu2 %v4082_v28  ;;  %4173 = vmatpush.msra.mxu0 %v4083_v31 }
 0x9cc   :  { %3915 = vmatpush.msra.mxu3 %v3914_v35  ;;  %4199 = vmatpush.msra.mxu1 %v4047_v24 }
 0x9cd   :  { %3917 = vmatmul.f32.vlgmr.msra.gmra.mxu3 %v3881_v22 }
 0x9ce   :  { %4014 = vmatpush.msrb.mxu3 %v3877_v32  ;;  %3995 = vmatmul.f32.vlgmr.msrb.gmra.mxu2 %v3881_v22 }
 0x9d0   :  { %4016 = vmatpush.msrb.mxu3 %v3879_v27 }
 0x9d2   :  { %4141 = vmatpush.msra.mxu3 %v4047_v24 }
 0x9d5   :  { %4018 = vmatmul.f32.vlgmr.msrb.gmra.mxu3 %v3881_v22 }
 0xa30   :  { %v3750_v2 = vpop.f32.mrf.mxu1 }
 0xa37   :  { %v3719_v33 = vpop.f32.mrf.mxu0  ;;  %v3776_v20 = vpop.f32.mrf.mxu2 }
 0xa38   :  { %v3751_v34 = vadd.f32 %v3750_v2, %v3719_v33  ;;  %v3851_v52 = vpop.f32.mrf.mxu1 }
 0xa39   :  { %v3801_v29 = vpop.f32.mrf.mxu3 }
 0xa3a   :  { %v3777_v21 = vadd.f32 %v3776_v20, %v3751_v34 }
 0xa3c   :  { %v3802_v53 = vadd.f32 %v3801_v29, %v3777_v21  ;;  %v4355_v29 = vmov 32.0  }
 0xa3d   :  { %4332 = vrcp.f32 %v4355_v29 }
 0xa3f   :  { %v3828_v49 = vpop.f32.mrf.mxu0 }
 0xa40   :  { %v3829_v5 = vadd.f32 %v3828_v49, %v3802_v53 }
 0xa42   :  { %v3852_v38 = vadd.f32 %v3851_v52, %v3829_v5 }
 0xa43   :  { %v3969_v45 = vpop.f32.mrf.mxu1  ;;  %v4333_v53 = vpop.eup %4332 }
 0xa44   :  { %v4027_v40 = vsel %vm553_vm1, %v3852_v38, 0  ;;  %v4223_v49 = vmul.f32 32.0, %v4333_v53 }
 0xa45   :  { %v4049_v41 = vand.u32 4294901760, %v4027_v40 }
 0xa46   :  { %v4224_v5 = vsub.f32 1.0, %v4223_v49 }
 0xa47   :  { %v4050_v59 = vsub.f32 %v4027_v40, %v4049_v41  ;;  %4088 = vmatmul.f32.vlgmr.msrb.gmra.mxu1 %v4049_v41  ;;  %v3944_v63 = vpop.f32.mrf.mxu0 }
 0xa48   :  { %v4225_v52 = vmul.f32 %v4333_v53, %v4224_v5 }
 0xa49   :  { %v4051_v46 = vand.u32 4294901760, %v4050_v59  ;;  %4116 = vmatmul.f32.vlgmr.msra.gmra.mxu2 %v4050_v59  ;;  %v3887_v43 = vpop.f32.mrf.mxu2 }
 0xa4a   :  { %v4226_v38 = vadd.f32 %v4333_v53, %v4225_v52 }
 0xa4b   :  { %v4052_v58 = vsub.f32 %v4050_v59, %v4051_v46  ;;  %4145 = vmatmul.f32.vlgmr.msra.gmra.mxu3 %v4051_v46 }
 0xa4d   :  { %v4053_v47 = vand.u32 4294901760, %v4052_v58 }
 0xa4f   :  { %4054 = vmatmul.f32.vlgmr.msrb.gmra.mxu0 %v4053_v47 }
 0xa50   :  { %v3918_v8 = vpop.f32.mrf.mxu3 }
 0xa51   :  { %v3919_v39 = vadd.f32 %v3918_v8, %v3887_v43  ;;  %v3996_v60 = vpop.f32.mrf.mxu2 }
 0xa53   :  { %v3945_v4 = vadd.f32 %v3944_v63, %v3919_v39 }
 0xa55   :  { %v3970_v44 = vadd.f32 %v3969_v45, %v3945_v4 }
 0xa57   :  { %v3997_v7 = vadd.f32 %v3996_v60, %v3970_v44 }
 0xa58   :  { %v4019_v14 = vpop.f32.mrf.mxu3 }
 0xa59   :  { %v4020_v50 = vadd.f32 %v4019_v14, %v3997_v7 }
 0xa5b   :  { %v4030_v3 = vsel %vm553_vm1, %v4020_v50, 0  ;;  %vm4227_vm1 = vweird.f32 %v4333_v53 }
 0xa5c   :  { %v4057_v56 = vand.u32 4294901760, %v4030_v3  ;;  %v4228_v40 = vsel %vm4227_vm1, %v4333_v53, %v4226_v38 }
 0xa5e   :  { %v4058_v19 = vsub.f32 %v4030_v3, %v4057_v56  ;;  %4092 = vmatmul.f32.gmra.mxu1 %v4057_v56 }
 0xa60   :  { %4121 = vmatmul.f32.gmra.mxu2 %v4058_v19  ;;  %v4059_v55 = vand.u32 4294901760, %v4058_v19 }
 0xa62   :  { %4151 = vmatmul.f32.gmra.mxu3 %v4059_v55  ;;  %v4060_v57 = vsub.f32 %v4058_v19, %v4059_v55 }
 0xa64   :  { %v4061_v9 = vand.u32 4294901760, %v4060_v57 }
 0xa66   :  { %4062 = vmatmul.f32.gmra.mxu0 %v4061_v9  ;;  %4201 = vmatmul.f32.vlgmr.msra.gmra.mxu1 %v4049_v41 }
 0xa6e   :  { %4175 = vmatmul.f32.vlgmr.msra.gmra.mxu0 %v4049_v41  ;;  %4205 = vmatmul.f32.gmra.mxu1 %v4057_v56 }
 0xa76   :  { %4179 = vmatmul.f32.gmra.mxu0 %v4057_v56 }
 0xac4   :  { %v4089_v1 = vpop.f32.mrf.mxu1 }
 0xacc   :  { %v4055_v18 = vpop.f32.mrf.mxu0  ;;  %v4117_v27 = vpop.f32.mrf.mxu2 }
 0xacd   :  { %v4090_v10 = vadd.f32 %v4089_v1, %v4055_v18  ;;  %v4267_v18 = vperm.slane %v4969_v54, 4 }
 0xace   :  { %v4146_v22 = vpop.f32.mrf.mxu3 }
 0xacf   :  { %v4118_v17 = vadd.f32 %v4117_v27, %v4090_v10 }
 0xad1   :  { %v4147_v25 = vadd.f32 %v4146_v22, %v4118_v17 }
 0xadb   :  { %v4093_v6 = vpop.f32.mrf.mxu1 }
 0xae3   :  { %v4063_v61 = vpop.f32.mrf.mxu0  ;;  %v4202_v26 = vpop.f32.mrf.mxu1 }
 0xae4   :  { %v4094_v12 = vadd.f32 %v4093_v6, %v4063_v61  ;;  %v4122_v15 = vpop.f32.mrf.mxu2  ;;  %v4270_v61 = vperm.slane %v4969_v54, 5 }
 0xae5   :  { %v4152_v11 = vpop.f32.mrf.mxu3 }
 0xae6   :  { %v4123_v16 = vadd.f32 %v4122_v15, %v4094_v12 }
 0xae8   :  { %v4153_v35 = vadd.f32 %v4152_v11, %v4123_v16 }
 0xaeb   :  { %v4176_v32 = vpop.f32.mrf.mxu0  ;;  %v4206_v42 = vpop.f32.mrf.mxu1 }
 0xaec   :  { %v4177_v23 = vadd.f32 %v4176_v32, %v4147_v25 }
 0xaee   :  { %v4203_v13 = vadd.f32 %v4202_v26, %v4177_v23 }
 0xaf0   :  { %v4209_v30 = vadd.f32 %v4203_v13, %v4937_v62  ;;  %v15_v62 = vld [vmem:[%s4995_s0 + $0x8] sm:$0xff] }
 0xaf2   :  { %v4212_v37 = vadd.f32 %v4211_v0, %v4209_v30 }
 0xaf3   :  { %v4180_v24 = vpop.f32.mrf.mxu0 }
 0xaf4   :  { %v4181_v28 = vadd.f32 %v4180_v24, %v4153_v35  ;;  %v4214_v31 = vadd.f32 %v4212_v37, %v14_v36 }
 0xaf6   :  { %v4207_v48 = vadd.f32 %v4206_v42, %v4181_v28  ;;  %v4216_v2 = vsel %vm31_vm0, %v4214_v31, 0.0 }
 0xaf7   :  { %4217 = vadd.xlane.f32.xlu0 %v4216_v2 }
 0xaf8   :  { %v4210_v33 = vadd.f32 %v4207_v48, %v4940_v51 }
 0xafa   :  { %v4213_v34 = vadd.f32 %v4211_v0, %v4210_v33 }
 0xafc   :  { %v4215_v20 = vadd.f32 %v4213_v34, %v15_v62 }
 0xafe   :  { %v4219_v21 = vsel %vm31_vm0, %v4215_v20, 0.0 }
 0xaff   :  { %4220 = vadd.xlane.f32.xlu1 %v4219_v21 }
 0xb6a   :  { %v4218_v41 = vpop.xlane.xlu0 %4217 }
 0xb6b   :  { %v4229_v51 = vmul.f32 %v4228_v40, %v4218_v41 }
 0xb6d   :  { %v4231_v59 = vsub.f32 %v4214_v31, %v4229_v51 }
 0xb6f   :  { %v4233_v46 = vmul.f32 %v4231_v59, %v4231_v59 }
 0xb71   :  { %v4235_v58 = vsel %vm31_vm0, %v4233_v46, 0.0 }
 0xb72   :  { %v4221_v43 = vpop.xlane.xlu1 %4220  ;;  %4236 = vadd.xlane.f32.xlu2 %v4235_v58 }
 0xb73   :  { %v4230_v47 = vmul.f32 %v4228_v40, %v4221_v43 }
 0xb75   :  { %v4232_v8 = vsub.f32 %v4215_v20, %v4230_v47 }
 0xb77   :  { %v4234_v39 = vmul.f32 %v4232_v8, %v4232_v8 }
 0xb79   :  { %v4238_v63 = vsel %vm31_vm0, %v4234_v39, 0.0 }
 0xb7a   :  { %4239 = vadd.xlane.f32.xlu0 %v4238_v63 }
 0xbe5   :  { %v4237_v4 = vpop.xlane.xlu2 %4236 }
 0xbe6   :  { %v4241_v45 = vmul.f32 %v4237_v4, %v4228_v40 }
 0xbe8   :  { %v4243_v44 = vadd.f32 1e-05, %v4241_v45 }
 0xbea   :  { %4334 = vrsqrt.f32 %v4243_v44  ;;  %vm4251_vm9 = vweird.f32 %v4243_v44 }
 0xbed   :  { %v4240_v60 = vpop.xlane.xlu0 %4239 }
 0xbee   :  { %v4242_v7 = vmul.f32 %v4240_v60, %v4228_v40 }
 0xbf0   :  { %v4335_v14 = vpop.eup %4334  ;;  %v4244_v50 = vadd.f32 1e-05, %v4242_v7 }
 0xbf1   :  { %v4246_v3 = vmul.f32 %v4335_v14, %v4243_v44  ;;  %vm4252_vm2 = vweird.f32 %v4335_v14 }
 0xbf2   :  { %4336 = vrsqrt.f32 %v4244_v50  ;;  %vm4253_vm10 = vmor %vm4251_vm9, %vm4252_vm2  ;;  %vm4261_vm12 = vweird.f32 %v4244_v50 }
 0xbf3   :  { %v4247_v56 = vmul.f32 %v4335_v14, %v4246_v3 }
 0xbf5   :  { %v4248_v19 = vmul.f32 0.5, %v4247_v56 }
 0xbf7   :  { %v4249_v55 = vsub.f32 1.5, %v4248_v19 }
 0xbf8   :  { %v4337_v57 = vpop.eup %4336 }
 0xbf9   :  { %v4250_v9 = vmul.f32 %v4335_v14, %v4249_v55  ;;  %v4256_v1 = vmul.f32 %v4337_v57, %v4244_v50  ;;  %vm4262_vm11 = vweird.f32 %v4337_v57 }
 0xbfa   :  { %vm4263_vm13 = vmor %vm4261_vm12, %vm4262_vm11 }
 0xbfb   :  { %v4254_v6 = vsel %vm4253_vm10, %v4335_v14, %v4250_v9  ;;  %v4257_v10 = vmul.f32 %v4337_v57, %v4256_v1 }
 0xbfc   :  { %v4265_v27 = vmul.f32 %v4254_v6, %v4231_v59 }
 0xbfd   :  { %v4258_v17 = vmul.f32 0.5, %v4257_v10 }
 0xbfe   :  { %v4268_v22 = vmul.f32 %v4267_v18, %v4265_v27 }
 0xbff   :  { %v4259_v25 = vsub.f32 1.5, %v4258_v17 }
 0xc00   :  { %v4271_v12 = vadd.f32 %v4270_v61, %v4268_v22 }
 0xc01   :  { %v4260_v26 = vmul.f32 %v4337_v57, %v4259_v25 }
 0xc02   :  { %4273 = vst.msk [vmem:[%s4997_s3] sm:$0xff] %vm31_vm0, %v4271_v12 }
 0xc03   :  { %v4264_v32 = vsel %vm4263_vm13, %v4337_v57, %v4260_v26 }
 0xc04   :  { %v4266_v23 = vmul.f32 %v4264_v32, %v4232_v8 }
 0xc06   :  { %v4269_v15 = vmul.f32 %v4267_v18, %v4266_v23 }
 0xc08   :  { %v4272_v16 = vadd.f32 %v4270_v61, %v4269_v15 }
 0xc0a   :  { %4274 = vst.msk [vmem:[%s4997_s3 + $0x8] sm:$0xff] %vm31_vm0, %v4272_v16 }

</bundles_post_ra>
